<compile_context>
chip_gen: v5e
topology: v5e:2x2
jax: 0.10.0
libtpu: 0.0.40
codegen_flags: <defaults>
</compile_context>

<pallas_src>
import jax
import jax.numpy as jnp
from jax import lax
from jax.experimental import pallas as pl
from jax.experimental.pallas import tpu as pltpu

# ---- model hyper-parameters (matching the PyTorch script, small where free) ----
VOCAB_SIZE = 20
EMBEDDING_SIZE = 64
HIDDEN_SIZE = 32
NUM_LAYERS = 2
OUTPUT_SIZE = 593
OUTPUT_PAD = 640       # 593 padded up to 5*128 for lane-dense output stores
BATCH = 2
SEQ = 8


# -------------------- fused Pallas kernel --------------------

def fused_forward_kernel(ids_ref,          # (B, T) int32, SMEM (scalar prefetch)
                         emb_ref,          # (V, 1, E) f32 embedding table (VMEM)
                         wih0_ref,         # (E, 4H)  bf16  layer-0 input weights (i|f|g|o)
                         b0_ref,           # (1, 4H)  f32   b_ih0 + b_hh0
                         wrec_ref,         # (2H, 8H) bf16  [[Whh0, Wih1],[0, Whh1]]
                         b1_ref,           # (1, 4H)  f32   b_ih1 + b_hh1
                         wout_ref,         # (H, O_pad) bf16, zero-padded
                         bout_ref,         # (1, O_pad) f32, zero-padded
                         out_ref,          # (B, O_pad) f32
                         x_sc):            # (T*B, E) f32 scratch for gathered embeddings
    B, T, H = BATCH, SEQ, HIDDEN_SIZE
    H4, H8 = 4 * H, 8 * H

    # ---- 1. Fused embedding gather: build time-major (T*B, E) x in VMEM ----
    for t in range(T):
        for b in range(B):
            tok = ids_ref[b, t]                       # SMEM scalar read
            r = t * B + b
            x_sc[r:r + 1, :] = emb_ref[tok]           # dynamic row read -> (1, E)

    # ---- 2. Hoisted layer-0 input projection for all T steps (one MXU op) ----
    xproj0 = jnp.dot(x_sc[...].astype(jnp.bfloat16), wih0_ref[...],
                     preferred_element_type=jnp.float32) + b0_ref[...]     # (T*B, 4H) f32

    wrec = wrec_ref[...]                                                    # (2H, 8H) bf16
    b1 = b1_ref[...]                                                        # (1, 4H)  f32

    # Per-stage additive term, built once (no per-iter broadcasts):
    # lanes [0:4H]  = xproj0 row for layer-0 step s (zeros for the final stage),
    # lanes [4H:8H] = b1 for layer-1.
    xp_ext = jnp.concatenate(
        [xproj0, jnp.zeros((B, H4), jnp.float32)], axis=0)                  # ((T+1)*B, 4H)
    addin = jnp.concatenate(
        [xp_ext, jnp.broadcast_to(b1, ((T + 1) * B, H4))], axis=-1)         # ((T+1)*B, 8H)

    def lstm_tail(sig, gates, c):
        # sig = sigmoid(gates); gates (B,4H) in PyTorch i|f|g|o order; math in f32.
        g = jnp.tanh(gates[:, 2 * H:3 * H])
        c_new = sig[:, H:2 * H] * c + sig[:, 0:H] * g
        h_new = sig[:, 3 * H:4 * H] * jnp.tanh(c_new)
        return h_new, c_new

    c0 = jnp.zeros((B, H), jnp.float32)
    c1 = jnp.zeros((B, H), jnp.float32)
    h1 = jnp.zeros((B, H), jnp.float32)

    # ---- 3. Wavefronted 2-layer recurrence (unrolled; h/c live in vregs) ----
    # Stage 0: layer-0 step 0 only (h0_{-1}=0 -> no recurrent matmul needed).
    g00 = xproj0[0:B, :]
    h0, c0 = lstm_tail(jax.nn.sigmoid(g00), g00, c0)

    # Stages 1..T: one fused (B,2H)@(2H,8H) matmul drives layer-0 step s and
    # layer-1 step s-1; one wide sigmoid over the full (B,8H) gate vector.
    for s in range(1, T + 1):
        lhs = jnp.concatenate([h0, h1], axis=-1).astype(jnp.bfloat16)       # (B, 2H)
        rec = jnp.dot(lhs, wrec, preferred_element_type=jnp.float32)        # (B, 8H)
        gates = rec + addin[s * B:(s + 1) * B, :]
        sig = jax.nn.sigmoid(gates)                                         # single EUP pass
        # layer-1 step s-1  (lanes 4H:8H)
        h1, c1 = lstm_tail(sig[:, H4:H8], gates[:, H4:H8], c1)
        # layer-0 step s    (lanes 0:4H); skipped on the final stage
        if s < T:
            h0, c0 = lstm_tail(sig[:, 0:H4], gates[:, 0:H4], c0)

    # ---- 4. Output head: Linear (padded, lane-dense) + sigmoid ----
    y = jnp.dot(h1.astype(jnp.bfloat16), wout_ref[...],
                preferred_element_type=jnp.float32) + bout_ref[...]         # (B, O_pad)
    out_ref[...] = jax.nn.sigmoid(y).astype(out_ref.dtype)


def fused_forward(ids, p):
    H4 = 4 * HIDDEN_SIZE
    return pl.pallas_call(
        fused_forward_kernel,
        out_shape=jax.ShapeDtypeStruct((BATCH, OUTPUT_PAD), jnp.float32),
        grid_spec=pltpu.PrefetchScalarGridSpec(
            num_scalar_prefetch=1,
            grid=(1,),
            in_specs=[
                pl.BlockSpec((VOCAB_SIZE, 1, EMBEDDING_SIZE), lambda i, ids: (0, 0, 0)),
                pl.BlockSpec((EMBEDDING_SIZE, H4), lambda i, ids: (0, 0)),
                pl.BlockSpec((1, H4), lambda i, ids: (0, 0)),
                pl.BlockSpec((2 * HIDDEN_SIZE, 8 * HIDDEN_SIZE), lambda i, ids: (0, 0)),
                pl.BlockSpec((1, H4), lambda i, ids: (0, 0)),
                pl.BlockSpec((HIDDEN_SIZE, OUTPUT_PAD), lambda i, ids: (0, 0)),
                pl.BlockSpec((1, OUTPUT_PAD), lambda i, ids: (0, 0)),
            ],
            out_specs=pl.BlockSpec((BATCH, OUTPUT_PAD), lambda i, ids: (0, 0)),
            scratch_shapes=[pltpu.VMEM((SEQ * BATCH, EMBEDDING_SIZE), jnp.float32)],
        ),
    )(ids, p["emb"], p["wih0"], p["b0"], p["wrec"], p["b1"], p["wout"], p["bout"])


# -------------------- parameters (pre-transposed / pre-packed at init) --------------------

def init_params(key):
    params = {}
    k_emb, k_lstm, k_out = jax.random.split(key, 3)

    # nn.Embedding default: N(0, 1)
    embedding = jax.random.normal(k_emb, (VOCAB_SIZE, EMBEDDING_SIZE), dtype=jnp.float32)
    params["embedding"] = embedding                                    # reference layout
    params["emb"] = embedding.reshape(VOCAB_SIZE, 1, EMBEDDING_SIZE)   # kernel layout

    # nn.LSTM default: U(-1/sqrt(H), 1/sqrt(H)); PyTorch layout, transposed once.
    bound = 1.0 / (HIDDEN_SIZE ** 0.5)
    lstm_keys = jax.random.split(k_lstm, NUM_LAYERS * 4)
    wih, whh, bsum = {}, {}, {}
    for l in range(NUM_LAYERS):
        in_dim = EMBEDDING_SIZE if l == 0 else HIDDEN_SIZE
        kw_ih, kw_hh, kb_ih, kb_hh = lstm_keys[4 * l:4 * l + 4]
        w_ih = jax.random.uniform(kw_ih, (4 * HIDDEN_SIZE, in_dim), jnp.float32, -bound, bound)
        w_hh = jax.random.uniform(kw_hh, (4 * HIDDEN_SIZE, HIDDEN_SIZE), jnp.float32, -bound, bound)
        b_ih = jax.random.uniform(kb_ih, (4 * HIDDEN_SIZE,), jnp.float32, -bound, bound)
        b_hh = jax.random.uniform(kb_hh, (4 * HIDDEN_SIZE,), jnp.float32, -bound, bound)
        wih[l] = jnp.transpose(w_ih)                                   # (in_dim, 4H)
        whh[l] = jnp.transpose(w_hh)                                   # (H, 4H)
        bsum[l] = (b_ih + b_hh).reshape(1, 4 * HIDDEN_SIZE)            # (1, 4H)

    # Kernel-packed weights: bf16 MXU operands, f32 biases.
    params["wih0"] = wih[0].astype(jnp.bfloat16)                       # (E, 4H)
    params["b0"] = bsum[0]
    # Fused recurrent block matrix [[Whh0, Wih1],[0, Whh1]]  -> (2H, 8H)
    top = jnp.concatenate([whh[0], wih[1]], axis=1)
    bot = jnp.concatenate([jnp.zeros_like(whh[1]), whh[1]], axis=1)
    params["wrec"] = jnp.concatenate([top, bot], axis=0).astype(jnp.bfloat16)
    params["b1"] = bsum[1]

    # nn.Linear default: U(-1/sqrt(fan_in), 1/sqrt(fan_in)); transpose + zero-pad once.
    kb_w, kb_b = jax.random.split(k_out)
    lbound = 1.0 / (HIDDEN_SIZE ** 0.5)
    w_out = jax.random.uniform(kb_w, (OUTPUT_SIZE, HIDDEN_SIZE), jnp.float32, -lbound, lbound)
    b_out = jax.random.uniform(kb_b, (OUTPUT_SIZE,), jnp.float32, -lbound, lbound)
    wout_pad = (jnp.zeros((HIDDEN_SIZE, OUTPUT_PAD), jnp.float32)
                .at[:, :OUTPUT_SIZE].set(jnp.transpose(w_out)))
    params["wout"] = wout_pad.astype(jnp.bfloat16)
    params["bout"] = (jnp.zeros((1, OUTPUT_PAD), jnp.float32)
                      .at[0, :OUTPUT_SIZE].set(b_out))

    # Full-precision copies for the pure-JAX reference.
    params["ref"] = {
        "wih0": wih[0], "whh0": whh[0], "b0": bsum[0],
        "wih1": wih[1], "whh1": whh[1], "b1": bsum[1],
        "wout": jnp.transpose(w_out), "bout": b_out,
    }
    return params


# -------------------- forward --------------------

@jax.jit
def my_model_forward(x_ids, params):
    out_pad = fused_forward(x_ids.astype(jnp.int32), params)          # (B, O_pad)
    # Drop the zero-padded output columns (padded bias cols give sigmoid(0)=0.5).
    return out_pad[:, :OUTPUT_SIZE]                                    # (B, O)


# -------------------- pure-JAX reference (correctness check) --------------------
# Mirrors the kernel's numerics: bf16 matmul operands, f32 accumulation, f32 gate math.

def _mm(a, w):
    return jnp.dot(a.astype(jnp.bfloat16), w.astype(jnp.bfloat16),
                   preferred_element_type=jnp.float32)


def reference_forward(x_ids, params):
    r = params["ref"]
    emb = jnp.take(params["embedding"], x_ids, axis=0)                 # (B, T, E)
    h_seq = emb
    for l in range(NUM_LAYERS):
        wih, whh, b = r[f"wih{l}"], r[f"whh{l}"], r[f"b{l}"]

        def step(carry, x_t):
            h, c = carry
            gates = _mm(x_t, wih) + _mm(h, whh) + b
            i = jax.nn.sigmoid(gates[:, :HIDDEN_SIZE])
            f = jax.nn.sigmoid(gates[:, HIDDEN_SIZE:2 * HIDDEN_SIZE])
            g = jnp.tanh(gates[:, 2 * HIDDEN_SIZE:3 * HIDDEN_SIZE])
            o = jax.nn.sigmoid(gates[:, 3 * HIDDEN_SIZE:])
            c = f * c + i * g
            h = o * jnp.tanh(c)
            return (h, c), h

        h0 = jnp.zeros((x_ids.shape[0], HIDDEN_SIZE), jnp.float32)
        (_, _), hs = lax.scan(step, (h0, h0), jnp.transpose(h_seq, (1, 0, 2)))
        h_seq = jnp.transpose(hs, (1, 0, 2))
    h_last = h_seq[:, -1, :]
    y = _mm(h_last, r["wout"]) + r["bout"]
    return jax.nn.sigmoid(y)


if __name__ == "__main__":
    key = jax.random.PRNGKey(0)
    k_param, k_x = jax.random.split(key)
    params = init_params(k_param)
    x = jax.random.randint(k_x, (BATCH, SEQ), 0, VOCAB_SIZE, dtype=jnp.int32)

    out = my_model_forward(x, params)
    out = jax.block_until_ready(out)

    assert out.shape == (BATCH, OUTPUT_SIZE)
    assert bool(jnp.all((out >= 0.0) & (out <= 1.0)))

    ref = jax.block_until_ready(reference_forward(x, params))
    assert bool(jnp.allclose(out, ref, atol=1e-4, rtol=1e-4)), "mismatch vs JAX reference"

    print("KERNEL_OK")
</pallas_src>

<mosaic_0001>
module attributes {stable_mosaic.version = 11 : i64} {
  func.func @fused_forward_kernel(%arg0: i32, %arg1: memref<2x8xi32, #tpu.memory_space<smem>>, %arg2: memref<20x1x64xf32, #tpu.memory_space<vmem>>, %arg3: memref<64x128xbf16, #tpu.memory_space<vmem>>, %arg4: memref<1x128xf32, #tpu.memory_space<vmem>>, %arg5: memref<64x256xbf16, #tpu.memory_space<vmem>>, %arg6: memref<1x128xf32, #tpu.memory_space<vmem>>, %arg7: memref<32x640xbf16, #tpu.memory_space<vmem>>, %arg8: memref<1x640xf32, #tpu.memory_space<vmem>>, %arg9: memref<2x640xf32, #tpu.memory_space<vmem>>, %arg10: memref<16x64xf32, #tpu.memory_space<vmem>>) attributes {dimension_semantics = [#tpu.dimension_semantics<arbitrary>], iteration_bounds = array<i64: 1>, scalar_prefetch = 1 : i64, scratch_operands = 1 : i64, tpu.core_type = #tpu.core_type<tc>, window_params = [{pipeline_mode = #tpu.pipeline_mode<synchronous>, transform_indices = @transform_0, window_bounds = array<i64: 20, 1, 64>}, {pipeline_mode = #tpu.pipeline_mode<synchronous>, transform_indices = @transform_1, window_bounds = array<i64: 64, 128>}, {pipeline_mode = #tpu.pipeline_mode<synchronous>, transform_indices = @transform_2, window_bounds = array<i64: 1, 128>}, {pipeline_mode = #tpu.pipeline_mode<synchronous>, transform_indices = @transform_3, window_bounds = array<i64: 64, 256>}, {pipeline_mode = #tpu.pipeline_mode<synchronous>, transform_indices = @transform_4, window_bounds = array<i64: 1, 128>}, {pipeline_mode = #tpu.pipeline_mode<synchronous>, transform_indices = @transform_5, window_bounds = array<i64: 32, 640>}, {pipeline_mode = #tpu.pipeline_mode<synchronous>, transform_indices = @transform_6, window_bounds = array<i64: 1, 640>}, {pipeline_mode = #tpu.pipeline_mode<synchronous>, transform_indices = @transform_7, window_bounds = array<i64: 2, 640>}]} {
    %c0 = arith.constant 0 : index
    %c0_0 = arith.constant 0 : index
    %0 = memref.load %arg1[%c0, %c0_0] : memref<2x8xi32, #tpu.memory_space<smem>>
    %1 = arith.index_cast %0 : i32 to index
    %c0_1 = arith.constant 0 : index
    %c0_2 = arith.constant 0 : index
    %2 = vector.load %arg2[%1, %c0_1, %c0_2] : memref<20x1x64xf32, #tpu.memory_space<vmem>>, vector<1x1x64xf32>
    %3 = vector.shape_cast %2 : vector<1x1x64xf32> to vector<1x64xf32>
    %c0_3 = arith.constant 0 : index
    %c0_4 = arith.constant 0 : index
    %4 = vector.load %arg10[%c0_3, %c0_4] : memref<16x64xf32, #tpu.memory_space<vmem>>, vector<1x64xf32>
    tpu.vector_store %arg10[%c0_3, %c0_4], %3 {strides = array<i32>} : memref<16x64xf32, #tpu.memory_space<vmem>>, vector<1x64xf32>,
    %c1 = arith.constant 1 : index
    %c0_5 = arith.constant 0 : index
    %5 = memref.load %arg1[%c1, %c0_5] : memref<2x8xi32, #tpu.memory_space<smem>>
    %6 = arith.index_cast %5 : i32 to index
    %c0_6 = arith.constant 0 : index
    %c0_7 = arith.constant 0 : index
    %7 = vector.load %arg2[%6, %c0_6, %c0_7] : memref<20x1x64xf32, #tpu.memory_space<vmem>>, vector<1x1x64xf32>
    %8 = vector.shape_cast %7 : vector<1x1x64xf32> to vector<1x64xf32>
    %c1_8 = arith.constant 1 : index
    %c0_9 = arith.constant 0 : index
    %9 = vector.load %arg10[%c1_8, %c0_9] : memref<16x64xf32, #tpu.memory_space<vmem>>, vector<1x64xf32>
    tpu.vector_store %arg10[%c1_8, %c0_9], %8 {strides = array<i32>} : memref<16x64xf32, #tpu.memory_space<vmem>>, vector<1x64xf32>,
    %c0_10 = arith.constant 0 : index
    %c1_11 = arith.constant 1 : index
    %10 = memref.load %arg1[%c0_10, %c1_11] : memref<2x8xi32, #tpu.memory_space<smem>>
    %11 = arith.index_cast %10 : i32 to index
    %c0_12 = arith.constant 0 : index
    %c0_13 = arith.constant 0 : index
    %12 = vector.load %arg2[%11, %c0_12, %c0_13] : memref<20x1x64xf32, #tpu.memory_space<vmem>>, vector<1x1x64xf32>
    %13 = vector.shape_cast %12 : vector<1x1x64xf32> to vector<1x64xf32>
    %c2 = arith.constant 2 : index
    %c0_14 = arith.constant 0 : index
    %14 = vector.load %arg10[%c2, %c0_14] : memref<16x64xf32, #tpu.memory_space<vmem>>, vector<1x64xf32>
    tpu.vector_store %arg10[%c2, %c0_14], %13 {strides = array<i32>} : memref<16x64xf32, #tpu.memory_space<vmem>>, vector<1x64xf32>,
    %c1_15 = arith.constant 1 : index
    %c1_16 = arith.constant 1 : index
    %15 = memref.load %arg1[%c1_15, %c1_16] : memref<2x8xi32, #tpu.memory_space<smem>>
    %16 = arith.index_cast %15 : i32 to index
    %c0_17 = arith.constant 0 : index
    %c0_18 = arith.constant 0 : index
    %17 = vector.load %arg2[%16, %c0_17, %c0_18] : memref<20x1x64xf32, #tpu.memory_space<vmem>>, vector<1x1x64xf32>
    %18 = vector.shape_cast %17 : vector<1x1x64xf32> to vector<1x64xf32>
    %c3 = arith.constant 3 : index
    %c0_19 = arith.constant 0 : index
    %19 = vector.load %arg10[%c3, %c0_19] : memref<16x64xf32, #tpu.memory_space<vmem>>, vector<1x64xf32>
    tpu.vector_store %arg10[%c3, %c0_19], %18 {strides = array<i32>} : memref<16x64xf32, #tpu.memory_space<vmem>>, vector<1x64xf32>,
    %c0_20 = arith.constant 0 : index
    %c2_21 = arith.constant 2 : index
    %20 = memref.load %arg1[%c0_20, %c2_21] : memref<2x8xi32, #tpu.memory_space<smem>>
    %21 = arith.index_cast %20 : i32 to index
    %c0_22 = arith.constant 0 : index
    %c0_23 = arith.constant 0 : index
    %22 = vector.load %arg2[%21, %c0_22, %c0_23] : memref<20x1x64xf32, #tpu.memory_space<vmem>>, vector<1x1x64xf32>
    %23 = vector.shape_cast %22 : vector<1x1x64xf32> to vector<1x64xf32>
    %c4 = arith.constant 4 : index
    %c0_24 = arith.constant 0 : index
    %24 = vector.load %arg10[%c4, %c0_24] : memref<16x64xf32, #tpu.memory_space<vmem>>, vector<1x64xf32>
    tpu.vector_store %arg10[%c4, %c0_24], %23 {strides = array<i32>} : memref<16x64xf32, #tpu.memory_space<vmem>>, vector<1x64xf32>,
    %c1_25 = arith.constant 1 : index
    %c2_26 = arith.constant 2 : index
    %25 = memref.load %arg1[%c1_25, %c2_26] : memref<2x8xi32, #tpu.memory_space<smem>>
    %26 = arith.index_cast %25 : i32 to index
    %c0_27 = arith.constant 0 : index
    %c0_28 = arith.constant 0 : index
    %27 = vector.load %arg2[%26, %c0_27, %c0_28] : memref<20x1x64xf32, #tpu.memory_space<vmem>>, vector<1x1x64xf32>
    %28 = vector.shape_cast %27 : vector<1x1x64xf32> to vector<1x64xf32>
    %c5 = arith.constant 5 : index
    %c0_29 = arith.constant 0 : index
    %29 = vector.load %arg10[%c5, %c0_29] : memref<16x64xf32, #tpu.memory_space<vmem>>, vector<1x64xf32>
    tpu.vector_store %arg10[%c5, %c0_29], %28 {strides = array<i32>} : memref<16x64xf32, #tpu.memory_space<vmem>>, vector<1x64xf32>,
    %c0_30 = arith.constant 0 : index
    %c3_31 = arith.constant 3 : index
    %30 = memref.load %arg1[%c0_30, %c3_31] : memref<2x8xi32, #tpu.memory_space<smem>>
    %31 = arith.index_cast %30 : i32 to index
    %c0_32 = arith.constant 0 : index
    %c0_33 = arith.constant 0 : index
    %32 = vector.load %arg2[%31, %c0_32, %c0_33] : memref<20x1x64xf32, #tpu.memory_space<vmem>>, vector<1x1x64xf32>
    %33 = vector.shape_cast %32 : vector<1x1x64xf32> to vector<1x64xf32>
    %c6 = arith.constant 6 : index
    %c0_34 = arith.constant 0 : index
    %34 = vector.load %arg10[%c6, %c0_34] : memref<16x64xf32, #tpu.memory_space<vmem>>, vector<1x64xf32>
    tpu.vector_store %arg10[%c6, %c0_34], %33 {strides = array<i32>} : memref<16x64xf32, #tpu.memory_space<vmem>>, vector<1x64xf32>,
    %c1_35 = arith.constant 1 : index
    %c3_36 = arith.constant 3 : index
    %35 = memref.load %arg1[%c1_35, %c3_36] : memref<2x8xi32, #tpu.memory_space<smem>>
    %36 = arith.index_cast %35 : i32 to index
    %c0_37 = arith.constant 0 : index
    %c0_38 = arith.constant 0 : index
    %37 = vector.load %arg2[%36, %c0_37, %c0_38] : memref<20x1x64xf32, #tpu.memory_space<vmem>>, vector<1x1x64xf32>
    %38 = vector.shape_cast %37 : vector<1x1x64xf32> to vector<1x64xf32>
    %c7 = arith.constant 7 : index
    %c0_39 = arith.constant 0 : index
    %39 = vector.load %arg10[%c7, %c0_39] : memref<16x64xf32, #tpu.memory_space<vmem>>, vector<1x64xf32>
    tpu.vector_store %arg10[%c7, %c0_39], %38 {strides = array<i32>} : memref<16x64xf32, #tpu.memory_space<vmem>>, vector<1x64xf32>,
    %c0_40 = arith.constant 0 : index
    %c4_41 = arith.constant 4 : index
    %40 = memref.load %arg1[%c0_40, %c4_41] : memref<2x8xi32, #tpu.memory_space<smem>>
    %41 = arith.index_cast %40 : i32 to index
    %c0_42 = arith.constant 0 : index
    %c0_43 = arith.constant 0 : index
    %42 = vector.load %arg2[%41, %c0_42, %c0_43] : memref<20x1x64xf32, #tpu.memory_space<vmem>>, vector<1x1x64xf32>
    %43 = vector.shape_cast %42 : vector<1x1x64xf32> to vector<1x64xf32>
    %c8 = arith.constant 8 : index
    %c0_44 = arith.constant 0 : index
    %44 = vector.load %arg10[%c8, %c0_44] : memref<16x64xf32, #tpu.memory_space<vmem>>, vector<1x64xf32>
    tpu.vector_store %arg10[%c8, %c0_44], %43 {strides = array<i32>} : memref<16x64xf32, #tpu.memory_space<vmem>>, vector<1x64xf32>,
    %c1_45 = arith.constant 1 : index
    %c4_46 = arith.constant 4 : index
    %45 = memref.load %arg1[%c1_45, %c4_46] : memref<2x8xi32, #tpu.memory_space<smem>>
    %46 = arith.index_cast %45 : i32 to index
    %c0_47 = arith.constant 0 : index
    %c0_48 = arith.constant 0 : index
    %47 = vector.load %arg2[%46, %c0_47, %c0_48] : memref<20x1x64xf32, #tpu.memory_space<vmem>>, vector<1x1x64xf32>
    %48 = vector.shape_cast %47 : vector<1x1x64xf32> to vector<1x64xf32>
    %c9 = arith.constant 9 : index
    %c0_49 = arith.constant 0 : index
    %49 = vector.load %arg10[%c9, %c0_49] : memref<16x64xf32, #tpu.memory_space<vmem>>, vector<1x64xf32>
    tpu.vector_store %arg10[%c9, %c0_49], %48 {strides = array<i32>} : memref<16x64xf32, #tpu.memory_space<vmem>>, vector<1x64xf32>,
    %c0_50 = arith.constant 0 : index
    %c5_51 = arith.constant 5 : index
    %50 = memref.load %arg1[%c0_50, %c5_51] : memref<2x8xi32, #tpu.memory_space<smem>>
    %51 = arith.index_cast %50 : i32 to index
    %c0_52 = arith.constant 0 : index
    %c0_53 = arith.constant 0 : index
    %52 = vector.load %arg2[%51, %c0_52, %c0_53] : memref<20x1x64xf32, #tpu.memory_space<vmem>>, vector<1x1x64xf32>
    %53 = vector.shape_cast %52 : vector<1x1x64xf32> to vector<1x64xf32>
    %c10 = arith.constant 10 : index
    %c0_54 = arith.constant 0 : index
    %54 = vector.load %arg10[%c10, %c0_54] : memref<16x64xf32, #tpu.memory_space<vmem>>, vector<1x64xf32>
    tpu.vector_store %arg10[%c10, %c0_54], %53 {strides = array<i32>} : memref<16x64xf32, #tpu.memory_space<vmem>>, vector<1x64xf32>,
    %c1_55 = arith.constant 1 : index
    %c5_56 = arith.constant 5 : index
    %55 = memref.load %arg1[%c1_55, %c5_56] : memref<2x8xi32, #tpu.memory_space<smem>>
    %56 = arith.index_cast %55 : i32 to index
    %c0_57 = arith.constant 0 : index
    %c0_58 = arith.constant 0 : index
    %57 = vector.load %arg2[%56, %c0_57, %c0_58] : memref<20x1x64xf32, #tpu.memory_space<vmem>>, vector<1x1x64xf32>
    %58 = vector.shape_cast %57 : vector<1x1x64xf32> to vector<1x64xf32>
    %c11 = arith.constant 11 : index
    %c0_59 = arith.constant 0 : index
    %59 = vector.load %arg10[%c11, %c0_59] : memref<16x64xf32, #tpu.memory_space<vmem>>, vector<1x64xf32>
    tpu.vector_store %arg10[%c11, %c0_59], %58 {strides = array<i32>} : memref<16x64xf32, #tpu.memory_space<vmem>>, vector<1x64xf32>,
    %c0_60 = arith.constant 0 : index
    %c6_61 = arith.constant 6 : index
    %60 = memref.load %arg1[%c0_60, %c6_61] : memref<2x8xi32, #tpu.memory_space<smem>>
    %61 = arith.index_cast %60 : i32 to index
    %c0_62 = arith.constant 0 : index
    %c0_63 = arith.constant 0 : index
    %62 = vector.load %arg2[%61, %c0_62, %c0_63] : memref<20x1x64xf32, #tpu.memory_space<vmem>>, vector<1x1x64xf32>
    %63 = vector.shape_cast %62 : vector<1x1x64xf32> to vector<1x64xf32>
    %c12 = arith.constant 12 : index
    %c0_64 = arith.constant 0 : index
    %64 = vector.load %arg10[%c12, %c0_64] : memref<16x64xf32, #tpu.memory_space<vmem>>, vector<1x64xf32>
    tpu.vector_store %arg10[%c12, %c0_64], %63 {strides = array<i32>} : memref<16x64xf32, #tpu.memory_space<vmem>>, vector<1x64xf32>,
    %c1_65 = arith.constant 1 : index
    %c6_66 = arith.constant 6 : index
    %65 = memref.load %arg1[%c1_65, %c6_66] : memref<2x8xi32, #tpu.memory_space<smem>>
    %66 = arith.index_cast %65 : i32 to index
    %c0_67 = arith.constant 0 : index
    %c0_68 = arith.constant 0 : index
    %67 = vector.load %arg2[%66, %c0_67, %c0_68] : memref<20x1x64xf32, #tpu.memory_space<vmem>>, vector<1x1x64xf32>
    %68 = vector.shape_cast %67 : vector<1x1x64xf32> to vector<1x64xf32>
    %c13 = arith.constant 13 : index
    %c0_69 = arith.constant 0 : index
    %69 = vector.load %arg10[%c13, %c0_69] : memref<16x64xf32, #tpu.memory_space<vmem>>, vector<1x64xf32>
    tpu.vector_store %arg10[%c13, %c0_69], %68 {strides = array<i32>} : memref<16x64xf32, #tpu.memory_space<vmem>>, vector<1x64xf32>,
    %c0_70 = arith.constant 0 : index
    %c7_71 = arith.constant 7 : index
    %70 = memref.load %arg1[%c0_70, %c7_71] : memref<2x8xi32, #tpu.memory_space<smem>>
    %71 = arith.index_cast %70 : i32 to index
    %c0_72 = arith.constant 0 : index
    %c0_73 = arith.constant 0 : index
    %72 = vector.load %arg2[%71, %c0_72, %c0_73] : memref<20x1x64xf32, #tpu.memory_space<vmem>>, vector<1x1x64xf32>
    %73 = vector.shape_cast %72 : vector<1x1x64xf32> to vector<1x64xf32>
    %c14 = arith.constant 14 : index
    %c0_74 = arith.constant 0 : index
    %74 = vector.load %arg10[%c14, %c0_74] : memref<16x64xf32, #tpu.memory_space<vmem>>, vector<1x64xf32>
    tpu.vector_store %arg10[%c14, %c0_74], %73 {strides = array<i32>} : memref<16x64xf32, #tpu.memory_space<vmem>>, vector<1x64xf32>,
    %c1_75 = arith.constant 1 : index
    %c7_76 = arith.constant 7 : index
    %75 = memref.load %arg1[%c1_75, %c7_76] : memref<2x8xi32, #tpu.memory_space<smem>>
    %76 = arith.index_cast %75 : i32 to index
    %c0_77 = arith.constant 0 : index
    %c0_78 = arith.constant 0 : index
    %77 = vector.load %arg2[%76, %c0_77, %c0_78] : memref<20x1x64xf32, #tpu.memory_space<vmem>>, vector<1x1x64xf32>
    %78 = vector.shape_cast %77 : vector<1x1x64xf32> to vector<1x64xf32>
    %c15 = arith.constant 15 : index
    %c0_79 = arith.constant 0 : index
    %79 = vector.load %arg10[%c15, %c0_79] : memref<16x64xf32, #tpu.memory_space<vmem>>, vector<1x64xf32>
    tpu.vector_store %arg10[%c15, %c0_79], %78 {strides = array<i32>} : memref<16x64xf32, #tpu.memory_space<vmem>>, vector<1x64xf32>,
    %c0_80 = arith.constant 0 : index
    %c0_81 = arith.constant 0 : index
    %80 = vector.load %arg10[%c0_80, %c0_81] : memref<16x64xf32, #tpu.memory_space<vmem>>, vector<16x64xf32>
    %81 = arith.truncf %80 : vector<16x64xf32> to vector<16x64xbf16>
    %c0_82 = arith.constant 0 : index
    %c0_83 = arith.constant 0 : index
    %82 = vector.load %arg3[%c0_82, %c0_83] : memref<64x128xbf16, #tpu.memory_space<vmem>>, vector<64x128xbf16>
    %cst = arith.constant dense<0.000000e+00> : vector<16x128xf32>
    %83 = tpu.matmul %81, %82, %cst {dimension_numbers = #tpu.dot_dimension_numbers<[1], [0], [0], [1], [0, 0, 1, 1], [], []>} : vector<16x64xbf16>, vector<64x128xbf16>, vector<16x128xf32> -> vector<16x128xf32>
    %c0_84 = arith.constant 0 : index
    %c0_85 = arith.constant 0 : index
    %84 = vector.load %arg4[%c0_84, %c0_85] : memref<1x128xf32, #tpu.memory_space<vmem>>, vector<1x128xf32>
    %85 = vector.broadcast %84 : vector<1x128xf32> to vector<16x128xf32>
    %86 = arith.addf %83, %85 : vector<16x128xf32>
    %c0_86 = arith.constant 0 : index
    %c0_87 = arith.constant 0 : index
    %87 = vector.load %arg5[%c0_86, %c0_87] : memref<64x256xbf16, #tpu.memory_space<vmem>>, vector<64x256xbf16>
    %c0_88 = arith.constant 0 : index
    %c0_89 = arith.constant 0 : index
    %88 = vector.load %arg6[%c0_88, %c0_89] : memref<1x128xf32, #tpu.memory_space<vmem>>, vector<1x128xf32>
    %cst_90 = arith.constant 0.000000e+00 : f32
    %89 = vector.broadcast %cst_90 : f32 to vector<2x128xf32>
    %90 = tpu.concatenate %86, %89 in 0 : vector<16x128xf32>, vector<2x128xf32> -> vector<18x128xf32>
    %91 = vector.shape_cast %88 : vector<1x128xf32> to vector<1x128xf32>
    %92 = vector.broadcast %91 : vector<1x128xf32> to vector<18x128xf32>
    %93 = tpu.concatenate %90, %92 in 1 : vector<18x128xf32>, vector<18x128xf32> -> vector<18x256xf32>
    %cst_91 = arith.constant 0.000000e+00 : f32
    %94 = vector.broadcast %cst_91 : f32 to vector<2x32xf32>
    %cst_92 = arith.constant 0.000000e+00 : f32
    %95 = vector.broadcast %cst_92 : f32 to vector<2x32xf32>
    %cst_93 = arith.constant 0.000000e+00 : f32
    %96 = vector.broadcast %cst_93 : f32 to vector<2x32xf32>
    %97 = vector.extract_strided_slice %86 {offsets = [0, 0], sizes = [2, 128], strides = [1, 1]} : vector<16x128xf32> to vector<2x128xf32>
    %98 = arith.negf %97 : vector<2x128xf32>
    %99 = math.exp %98 : vector<2x128xf32>
    %cst_94 = arith.constant 1.000000e+00 : f32
    %100 = vector.broadcast %cst_94 : f32 to vector<2x128xf32>
    %101 = arith.addf %100, %99 : vector<2x128xf32>
    %102 = arith.divf %100, %101 : vector<2x128xf32>
    %103 = vector.extract_strided_slice %97 {offsets = [0, 64], sizes = [2, 32], strides = [1, 1]} : vector<2x128xf32> to vector<2x32xf32>
    %104 = math.tanh %103 : vector<2x32xf32>
    %105 = vector.extract_strided_slice %102 {offsets = [0, 32], sizes = [2, 32], strides = [1, 1]} : vector<2x128xf32> to vector<2x32xf32>
    %106 = arith.mulf %105, %94 : vector<2x32xf32>
    %107 = vector.extract_strided_slice %102 {offsets = [0, 0], sizes = [2, 32], strides = [1, 1]} : vector<2x128xf32> to vector<2x32xf32>
    %108 = arith.mulf %107, %104 : vector<2x32xf32>
    %109 = arith.addf %106, %108 : vector<2x32xf32>
    %110 = vector.extract_strided_slice %102 {offsets = [0, 96], sizes = [2, 32], strides = [1, 1]} : vector<2x128xf32> to vector<2x32xf32>
    %111 = math.tanh %109 : vector<2x32xf32>
    %112 = arith.mulf %110, %111 : vector<2x32xf32>
    %113 = tpu.concatenate %112, %96 in 1 : vector<2x32xf32>, vector<2x32xf32> -> vector<2x64xf32>
    %114 = arith.truncf %113 : vector<2x64xf32> to vector<2x64xbf16>
    %cst_95 = arith.constant dense<0.000000e+00> : vector<2x256xf32>
    %115 = tpu.matmul %114, %87, %cst_95 {dimension_numbers = #tpu.dot_dimension_numbers<[1], [0], [0], [1], [0, 0, 1, 1], [], []>} : vector<2x64xbf16>, vector<64x256xbf16>, vector<2x256xf32> -> vector<2x256xf32>
    %116 = vector.extract_strided_slice %93 {offsets = [2, 0], sizes = [2, 256], strides = [1, 1]} : vector<18x256xf32> to vector<2x256xf32>
    %117 = arith.addf %115, %116 : vector<2x256xf32>
    %118 = arith.negf %117 : vector<2x256xf32>
    %119 = math.exp %118 : vector<2x256xf32>
    %cst_96 = arith.constant 1.000000e+00 : f32
    %120 = vector.broadcast %cst_96 : f32 to vector<2x256xf32>
    %121 = arith.addf %120, %119 : vector<2x256xf32>
    %122 = arith.divf %120, %121 : vector<2x256xf32>
    %123 = vector.extract_strided_slice %122 {offsets = [0, 128], sizes = [2, 128], strides = [1, 1]} : vector<2x256xf32> to vector<2x128xf32>
    %124 = vector.extract_strided_slice %117 {offsets = [0, 128], sizes = [2, 128], strides = [1, 1]} : vector<2x256xf32> to vector<2x128xf32>
    %125 = vector.extract_strided_slice %124 {offsets = [0, 64], sizes = [2, 32], strides = [1, 1]} : vector<2x128xf32> to vector<2x32xf32>
    %126 = math.tanh %125 : vector<2x32xf32>
    %127 = vector.extract_strided_slice %123 {offsets = [0, 32], sizes = [2, 32], strides = [1, 1]} : vector<2x128xf32> to vector<2x32xf32>
    %128 = arith.mulf %127, %95 : vector<2x32xf32>
    %129 = vector.extract_strided_slice %123 {offsets = [0, 0], sizes = [2, 32], strides = [1, 1]} : vector<2x128xf32> to vector<2x32xf32>
    %130 = arith.mulf %129, %126 : vector<2x32xf32>
    %131 = arith.addf %128, %130 : vector<2x32xf32>
    %132 = vector.extract_strided_slice %123 {offsets = [0, 96], sizes = [2, 32], strides = [1, 1]} : vector<2x128xf32> to vector<2x32xf32>
    %133 = math.tanh %131 : vector<2x32xf32>
    %134 = arith.mulf %132, %133 : vector<2x32xf32>
    %135 = vector.extract_strided_slice %122 {offsets = [0, 0], sizes = [2, 128], strides = [1, 1]} : vector<2x256xf32> to vector<2x128xf32>
    %136 = vector.extract_strided_slice %117 {offsets = [0, 0], sizes = [2, 128], strides = [1, 1]} : vector<2x256xf32> to vector<2x128xf32>
    %137 = vector.extract_strided_slice %136 {offsets = [0, 64], sizes = [2, 32], strides = [1, 1]} : vector<2x128xf32> to vector<2x32xf32>
    %138 = math.tanh %137 : vector<2x32xf32>
    %139 = vector.extract_strided_slice %135 {offsets = [0, 32], sizes = [2, 32], strides = [1, 1]} : vector<2x128xf32> to vector<2x32xf32>
    %140 = arith.mulf %139, %109 : vector<2x32xf32>
    %141 = vector.extract_strided_slice %135 {offsets = [0, 0], sizes = [2, 32], strides = [1, 1]} : vector<2x128xf32> to vector<2x32xf32>
    %142 = arith.mulf %141, %138 : vector<2x32xf32>
    %143 = arith.addf %140, %142 : vector<2x32xf32>
    %144 = vector.extract_strided_slice %135 {offsets = [0, 96], sizes = [2, 32], strides = [1, 1]} : vector<2x128xf32> to vector<2x32xf32>
    %145 = math.tanh %143 : vector<2x32xf32>
    %146 = arith.mulf %144, %145 : vector<2x32xf32>
    %147 = tpu.concatenate %146, %134 in 1 : vector<2x32xf32>, vector<2x32xf32> -> vector<2x64xf32>
    %148 = arith.truncf %147 : vector<2x64xf32> to vector<2x64xbf16>
    %cst_97 = arith.constant dense<0.000000e+00> : vector<2x256xf32>
    %149 = tpu.matmul %148, %87, %cst_97 {dimension_numbers = #tpu.dot_dimension_numbers<[1], [0], [0], [1], [0, 0, 1, 1], [], []>} : vector<2x64xbf16>, vector<64x256xbf16>, vector<2x256xf32> -> vector<2x256xf32>
    %150 = vector.extract_strided_slice %93 {offsets = [4, 0], sizes = [2, 256], strides = [1, 1]} : vector<18x256xf32> to vector<2x256xf32>
    %151 = arith.addf %149, %150 : vector<2x256xf32>
    %152 = arith.negf %151 : vector<2x256xf32>
    %153 = math.exp %152 : vector<2x256xf32>
    %cst_98 = arith.constant 1.000000e+00 : f32
    %154 = vector.broadcast %cst_98 : f32 to vector<2x256xf32>
    %155 = arith.addf %154, %153 : vector<2x256xf32>
    %156 = arith.divf %154, %155 : vector<2x256xf32>
    %157 = vector.extract_strided_slice %156 {offsets = [0, 128], sizes = [2, 128], strides = [1, 1]} : vector<2x256xf32> to vector<2x128xf32>
    %158 = vector.extract_strided_slice %151 {offsets = [0, 128], sizes = [2, 128], strides = [1, 1]} : vector<2x256xf32> to vector<2x128xf32>
    %159 = vector.extract_strided_slice %158 {offsets = [0, 64], sizes = [2, 32], strides = [1, 1]} : vector<2x128xf32> to vector<2x32xf32>
    %160 = math.tanh %159 : vector<2x32xf32>
    %161 = vector.extract_strided_slice %157 {offsets = [0, 32], sizes = [2, 32], strides = [1, 1]} : vector<2x128xf32> to vector<2x32xf32>
    %162 = arith.mulf %161, %131 : vector<2x32xf32>
    %163 = vector.extract_strided_slice %157 {offsets = [0, 0], sizes = [2, 32], strides = [1, 1]} : vector<2x128xf32> to vector<2x32xf32>
    %164 = arith.mulf %163, %160 : vector<2x32xf32>
    %165 = arith.addf %162, %164 : vector<2x32xf32>
    %166 = vector.extract_strided_slice %157 {offsets = [0, 96], sizes = [2, 32], strides = [1, 1]} : vector<2x128xf32> to vector<2x32xf32>
    %167 = math.tanh %165 : vector<2x32xf32>
    %168 = arith.mulf %166, %167 : vector<2x32xf32>
    %169 = vector.extract_strided_slice %156 {offsets = [0, 0], sizes = [2, 128], strides = [1, 1]} : vector<2x256xf32> to vector<2x128xf32>
    %170 = vector.extract_strided_slice %151 {offsets = [0, 0], sizes = [2, 128], strides = [1, 1]} : vector<2x256xf32> to vector<2x128xf32>
    %171 = vector.extract_strided_slice %170 {offsets = [0, 64], sizes = [2, 32], strides = [1, 1]} : vector<2x128xf32> to vector<2x32xf32>
    %172 = math.tanh %171 : vector<2x32xf32>
    %173 = vector.extract_strided_slice %169 {offsets = [0, 32], sizes = [2, 32], strides = [1, 1]} : vector<2x128xf32> to vector<2x32xf32>
    %174 = arith.mulf %173, %143 : vector<2x32xf32>
    %175 = vector.extract_strided_slice %169 {offsets = [0, 0], sizes = [2, 32], strides = [1, 1]} : vector<2x128xf32> to vector<2x32xf32>
    %176 = arith.mulf %175, %172 : vector<2x32xf32>
    %177 = arith.addf %174, %176 : vector<2x32xf32>
    %178 = vector.extract_strided_slice %169 {offsets = [0, 96], sizes = [2, 32], strides = [1, 1]} : vector<2x128xf32> to vector<2x32xf32>
    %179 = math.tanh %177 : vector<2x32xf32>
    %180 = arith.mulf %178, %179 : vector<2x32xf32>
    %181 = tpu.concatenate %180, %168 in 1 : vector<2x32xf32>, vector<2x32xf32> -> vector<2x64xf32>
    %182 = arith.truncf %181 : vector<2x64xf32> to vector<2x64xbf16>
    %cst_99 = arith.constant dense<0.000000e+00> : vector<2x256xf32>
    %183 = tpu.matmul %182, %87, %cst_99 {dimension_numbers = #tpu.dot_dimension_numbers<[1], [0], [0], [1], [0, 0, 1, 1], [], []>} : vector<2x64xbf16>, vector<64x256xbf16>, vector<2x256xf32> -> vector<2x256xf32>
    %184 = vector.extract_strided_slice %93 {offsets = [6, 0], sizes = [2, 256], strides = [1, 1]} : vector<18x256xf32> to vector<2x256xf32>
    %185 = arith.addf %183, %184 : vector<2x256xf32>
    %186 = arith.negf %185 : vector<2x256xf32>
    %187 = math.exp %186 : vector<2x256xf32>
    %cst_100 = arith.constant 1.000000e+00 : f32
    %188 = vector.broadcast %cst_100 : f32 to vector<2x256xf32>
    %189 = arith.addf %188, %187 : vector<2x256xf32>
    %190 = arith.divf %188, %189 : vector<2x256xf32>
    %191 = vector.extract_strided_slice %190 {offsets = [0, 128], sizes = [2, 128], strides = [1, 1]} : vector<2x256xf32> to vector<2x128xf32>
    %192 = vector.extract_strided_slice %185 {offsets = [0, 128], sizes = [2, 128], strides = [1, 1]} : vector<2x256xf32> to vector<2x128xf32>
    %193 = vector.extract_strided_slice %192 {offsets = [0, 64], sizes = [2, 32], strides = [1, 1]} : vector<2x128xf32> to vector<2x32xf32>
    %194 = math.tanh %193 : vector<2x32xf32>
    %195 = vector.extract_strided_slice %191 {offsets = [0, 32], sizes = [2, 32], strides = [1, 1]} : vector<2x128xf32> to vector<2x32xf32>
    %196 = arith.mulf %195, %165 : vector<2x32xf32>
    %197 = vector.extract_strided_slice %191 {offsets = [0, 0], sizes = [2, 32], strides = [1, 1]} : vector<2x128xf32> to vector<2x32xf32>
    %198 = arith.mulf %197, %194 : vector<2x32xf32>
    %199 = arith.addf %196, %198 : vector<2x32xf32>
    %200 = vector.extract_strided_slice %191 {offsets = [0, 96], sizes = [2, 32], strides = [1, 1]} : vector<2x128xf32> to vector<2x32xf32>
    %201 = math.tanh %199 : vector<2x32xf32>
    %202 = arith.mulf %200, %201 : vector<2x32xf32>
    %203 = vector.extract_strided_slice %190 {offsets = [0, 0], sizes = [2, 128], strides = [1, 1]} : vector<2x256xf32> to vector<2x128xf32>
    %204 = vector.extract_strided_slice %185 {offsets = [0, 0], sizes = [2, 128], strides = [1, 1]} : vector<2x256xf32> to vector<2x128xf32>
    %205 = vector.extract_strided_slice %204 {offsets = [0, 64], sizes = [2, 32], strides = [1, 1]} : vector<2x128xf32> to vector<2x32xf32>
    %206 = math.tanh %205 : vector<2x32xf32>
    %207 = vector.extract_strided_slice %203 {offsets = [0, 32], sizes = [2, 32], strides = [1, 1]} : vector<2x128xf32> to vector<2x32xf32>
    %208 = arith.mulf %207, %177 : vector<2x32xf32>
    %209 = vector.extract_strided_slice %203 {offsets = [0, 0], sizes = [2, 32], strides = [1, 1]} : vector<2x128xf32> to vector<2x32xf32>
    %210 = arith.mulf %209, %206 : vector<2x32xf32>
    %211 = arith.addf %208, %210 : vector<2x32xf32>
    %212 = vector.extract_strided_slice %203 {offsets = [0, 96], sizes = [2, 32], strides = [1, 1]} : vector<2x128xf32> to vector<2x32xf32>
    %213 = math.tanh %211 : vector<2x32xf32>
    %214 = arith.mulf %212, %213 : vector<2x32xf32>
    %215 = tpu.concatenate %214, %202 in 1 : vector<2x32xf32>, vector<2x32xf32> -> vector<2x64xf32>
    %216 = arith.truncf %215 : vector<2x64xf32> to vector<2x64xbf16>
    %cst_101 = arith.constant dense<0.000000e+00> : vector<2x256xf32>
    %217 = tpu.matmul %216, %87, %cst_101 {dimension_numbers = #tpu.dot_dimension_numbers<[1], [0], [0], [1], [0, 0, 1, 1], [], []>} : vector<2x64xbf16>, vector<64x256xbf16>, vector<2x256xf32> -> vector<2x256xf32>
    %218 = vector.extract_strided_slice %93 {offsets = [8, 0], sizes = [2, 256], strides = [1, 1]} : vector<18x256xf32> to vector<2x256xf32>
    %219 = arith.addf %217, %218 : vector<2x256xf32>
    %220 = arith.negf %219 : vector<2x256xf32>
    %221 = math.exp %220 : vector<2x256xf32>
    %cst_102 = arith.constant 1.000000e+00 : f32
    %222 = vector.broadcast %cst_102 : f32 to vector<2x256xf32>
    %223 = arith.addf %222, %221 : vector<2x256xf32>
    %224 = arith.divf %222, %223 : vector<2x256xf32>
    %225 = vector.extract_strided_slice %224 {offsets = [0, 128], sizes = [2, 128], strides = [1, 1]} : vector<2x256xf32> to vector<2x128xf32>
    %226 = vector.extract_strided_slice %219 {offsets = [0, 128], sizes = [2, 128], strides = [1, 1]} : vector<2x256xf32> to vector<2x128xf32>
    %227 = vector.extract_strided_slice %226 {offsets = [0, 64], sizes = [2, 32], strides = [1, 1]} : vector<2x128xf32> to vector<2x32xf32>
    %228 = math.tanh %227 : vector<2x32xf32>
    %229 = vector.extract_strided_slice %225 {offsets = [0, 32], sizes = [2, 32], strides = [1, 1]} : vector<2x128xf32> to vector<2x32xf32>
    %230 = arith.mulf %229, %199 : vector<2x32xf32>
    %231 = vector.extract_strided_slice %225 {offsets = [0, 0], sizes = [2, 32], strides = [1, 1]} : vector<2x128xf32> to vector<2x32xf32>
    %232 = arith.mulf %231, %228 : vector<2x32xf32>
    %233 = arith.addf %230, %232 : vector<2x32xf32>
    %234 = vector.extract_strided_slice %225 {offsets = [0, 96], sizes = [2, 32], strides = [1, 1]} : vector<2x128xf32> to vector<2x32xf32>
    %235 = math.tanh %233 : vector<2x32xf32>
    %236 = arith.mulf %234, %235 : vector<2x32xf32>
    %237 = vector.extract_strided_slice %224 {offsets = [0, 0], sizes = [2, 128], strides = [1, 1]} : vector<2x256xf32> to vector<2x128xf32>
    %238 = vector.extract_strided_slice %219 {offsets = [0, 0], sizes = [2, 128], strides = [1, 1]} : vector<2x256xf32> to vector<2x128xf32>
    %239 = vector.extract_strided_slice %238 {offsets = [0, 64], sizes = [2, 32], strides = [1, 1]} : vector<2x128xf32> to vector<2x32xf32>
    %240 = math.tanh %239 : vector<2x32xf32>
    %241 = vector.extract_strided_slice %237 {offsets = [0, 32], sizes = [2, 32], strides = [1, 1]} : vector<2x128xf32> to vector<2x32xf32>
    %242 = arith.mulf %241, %211 : vector<2x32xf32>
    %243 = vector.extract_strided_slice %237 {offsets = [0, 0], sizes = [2, 32], strides = [1, 1]} : vector<2x128xf32> to vector<2x32xf32>
    %244 = arith.mulf %243, %240 : vector<2x32xf32>
    %245 = arith.addf %242, %244 : vector<2x32xf32>
    %246 = vector.extract_strided_slice %237 {offsets = [0, 96], sizes = [2, 32], strides = [1, 1]} : vector<2x128xf32> to vector<2x32xf32>
    %247 = math.tanh %245 : vector<2x32xf32>
    %248 = arith.mulf %246, %247 : vector<2x32xf32>
    %249 = tpu.concatenate %248, %236 in 1 : vector<2x32xf32>, vector<2x32xf32> -> vector<2x64xf32>
    %250 = arith.truncf %249 : vector<2x64xf32> to vector<2x64xbf16>
    %cst_103 = arith.constant dense<0.000000e+00> : vector<2x256xf32>
    %251 = tpu.matmul %250, %87, %cst_103 {dimension_numbers = #tpu.dot_dimension_numbers<[1], [0], [0], [1], [0, 0, 1, 1], [], []>} : vector<2x64xbf16>, vector<64x256xbf16>, vector<2x256xf32> -> vector<2x256xf32>
    %252 = vector.extract_strided_slice %93 {offsets = [10, 0], sizes = [2, 256], strides = [1, 1]} : vector<18x256xf32> to vector<2x256xf32>
    %253 = arith.addf %251, %252 : vector<2x256xf32>
    %254 = arith.negf %253 : vector<2x256xf32>
    %255 = math.exp %254 : vector<2x256xf32>
    %cst_104 = arith.constant 1.000000e+00 : f32
    %256 = vector.broadcast %cst_104 : f32 to vector<2x256xf32>
    %257 = arith.addf %256, %255 : vector<2x256xf32>
    %258 = arith.divf %256, %257 : vector<2x256xf32>
    %259 = vector.extract_strided_slice %258 {offsets = [0, 128], sizes = [2, 128], strides = [1, 1]} : vector<2x256xf32> to vector<2x128xf32>
    %260 = vector.extract_strided_slice %253 {offsets = [0, 128], sizes = [2, 128], strides = [1, 1]} : vector<2x256xf32> to vector<2x128xf32>
    %261 = vector.extract_strided_slice %260 {offsets = [0, 64], sizes = [2, 32], strides = [1, 1]} : vector<2x128xf32> to vector<2x32xf32>
    %262 = math.tanh %261 : vector<2x32xf32>
    %263 = vector.extract_strided_slice %259 {offsets = [0, 32], sizes = [2, 32], strides = [1, 1]} : vector<2x128xf32> to vector<2x32xf32>
    %264 = arith.mulf %263, %233 : vector<2x32xf32>
    %265 = vector.extract_strided_slice %259 {offsets = [0, 0], sizes = [2, 32], strides = [1, 1]} : vector<2x128xf32> to vector<2x32xf32>
    %266 = arith.mulf %265, %262 : vector<2x32xf32>
    %267 = arith.addf %264, %266 : vector<2x32xf32>
    %268 = vector.extract_strided_slice %259 {offsets = [0, 96], sizes = [2, 32], strides = [1, 1]} : vector<2x128xf32> to vector<2x32xf32>
    %269 = math.tanh %267 : vector<2x32xf32>
    %270 = arith.mulf %268, %269 : vector<2x32xf32>
    %271 = vector.extract_strided_slice %258 {offsets = [0, 0], sizes = [2, 128], strides = [1, 1]} : vector<2x256xf32> to vector<2x128xf32>
    %272 = vector.extract_strided_slice %253 {offsets = [0, 0], sizes = [2, 128], strides = [1, 1]} : vector<2x256xf32> to vector<2x128xf32>
    %273 = vector.extract_strided_slice %272 {offsets = [0, 64], sizes = [2, 32], strides = [1, 1]} : vector<2x128xf32> to vector<2x32xf32>
    %274 = math.tanh %273 : vector<2x32xf32>
    %275 = vector.extract_strided_slice %271 {offsets = [0, 32], sizes = [2, 32], strides = [1, 1]} : vector<2x128xf32> to vector<2x32xf32>
    %276 = arith.mulf %275, %245 : vector<2x32xf32>
    %277 = vector.extract_strided_slice %271 {offsets = [0, 0], sizes = [2, 32], strides = [1, 1]} : vector<2x128xf32> to vector<2x32xf32>
    %278 = arith.mulf %277, %274 : vector<2x32xf32>
    %279 = arith.addf %276, %278 : vector<2x32xf32>
    %280 = vector.extract_strided_slice %271 {offsets = [0, 96], sizes = [2, 32], strides = [1, 1]} : vector<2x128xf32> to vector<2x32xf32>
    %281 = math.tanh %279 : vector<2x32xf32>
    %282 = arith.mulf %280, %281 : vector<2x32xf32>
    %283 = tpu.concatenate %282, %270 in 1 : vector<2x32xf32>, vector<2x32xf32> -> vector<2x64xf32>
    %284 = arith.truncf %283 : vector<2x64xf32> to vector<2x64xbf16>
    %cst_105 = arith.constant dense<0.000000e+00> : vector<2x256xf32>
    %285 = tpu.matmul %284, %87, %cst_105 {dimension_numbers = #tpu.dot_dimension_numbers<[1], [0], [0], [1], [0, 0, 1, 1], [], []>} : vector<2x64xbf16>, vector<64x256xbf16>, vector<2x256xf32> -> vector<2x256xf32>
    %286 = vector.extract_strided_slice %93 {offsets = [12, 0], sizes = [2, 256], strides = [1, 1]} : vector<18x256xf32> to vector<2x256xf32>
    %287 = arith.addf %285, %286 : vector<2x256xf32>
    %288 = arith.negf %287 : vector<2x256xf32>
    %289 = math.exp %288 : vector<2x256xf32>
    %cst_106 = arith.constant 1.000000e+00 : f32
    %290 = vector.broadcast %cst_106 : f32 to vector<2x256xf32>
    %291 = arith.addf %290, %289 : vector<2x256xf32>
    %292 = arith.divf %290, %291 : vector<2x256xf32>
    %293 = vector.extract_strided_slice %292 {offsets = [0, 128], sizes = [2, 128], strides = [1, 1]} : vector<2x256xf32> to vector<2x128xf32>
    %294 = vector.extract_strided_slice %287 {offsets = [0, 128], sizes = [2, 128], strides = [1, 1]} : vector<2x256xf32> to vector<2x128xf32>
    %295 = vector.extract_strided_slice %294 {offsets = [0, 64], sizes = [2, 32], strides = [1, 1]} : vector<2x128xf32> to vector<2x32xf32>
    %296 = math.tanh %295 : vector<2x32xf32>
    %297 = vector.extract_strided_slice %293 {offsets = [0, 32], sizes = [2, 32], strides = [1, 1]} : vector<2x128xf32> to vector<2x32xf32>
    %298 = arith.mulf %297, %267 : vector<2x32xf32>
    %299 = vector.extract_strided_slice %293 {offsets = [0, 0], sizes = [2, 32], strides = [1, 1]} : vector<2x128xf32> to vector<2x32xf32>
    %300 = arith.mulf %299, %296 : vector<2x32xf32>
    %301 = arith.addf %298, %300 : vector<2x32xf32>
    %302 = vector.extract_strided_slice %293 {offsets = [0, 96], sizes = [2, 32], strides = [1, 1]} : vector<2x128xf32> to vector<2x32xf32>
    %303 = math.tanh %301 : vector<2x32xf32>
    %304 = arith.mulf %302, %303 : vector<2x32xf32>
    %305 = vector.extract_strided_slice %292 {offsets = [0, 0], sizes = [2, 128], strides = [1, 1]} : vector<2x256xf32> to vector<2x128xf32>
    %306 = vector.extract_strided_slice %287 {offsets = [0, 0], sizes = [2, 128], strides = [1, 1]} : vector<2x256xf32> to vector<2x128xf32>
    %307 = vector.extract_strided_slice %306 {offsets = [0, 64], sizes = [2, 32], strides = [1, 1]} : vector<2x128xf32> to vector<2x32xf32>
    %308 = math.tanh %307 : vector<2x32xf32>
    %309 = vector.extract_strided_slice %305 {offsets = [0, 32], sizes = [2, 32], strides = [1, 1]} : vector<2x128xf32> to vector<2x32xf32>
    %310 = arith.mulf %309, %279 : vector<2x32xf32>
    %311 = vector.extract_strided_slice %305 {offsets = [0, 0], sizes = [2, 32], strides = [1, 1]} : vector<2x128xf32> to vector<2x32xf32>
    %312 = arith.mulf %311, %308 : vector<2x32xf32>
    %313 = arith.addf %310, %312 : vector<2x32xf32>
    %314 = vector.extract_strided_slice %305 {offsets = [0, 96], sizes = [2, 32], strides = [1, 1]} : vector<2x128xf32> to vector<2x32xf32>
    %315 = math.tanh %313 : vector<2x32xf32>
    %316 = arith.mulf %314, %315 : vector<2x32xf32>
    %317 = tpu.concatenate %316, %304 in 1 : vector<2x32xf32>, vector<2x32xf32> -> vector<2x64xf32>
    %318 = arith.truncf %317 : vector<2x64xf32> to vector<2x64xbf16>
    %cst_107 = arith.constant dense<0.000000e+00> : vector<2x256xf32>
    %319 = tpu.matmul %318, %87, %cst_107 {dimension_numbers = #tpu.dot_dimension_numbers<[1], [0], [0], [1], [0, 0, 1, 1], [], []>} : vector<2x64xbf16>, vector<64x256xbf16>, vector<2x256xf32> -> vector<2x256xf32>
    %320 = vector.extract_strided_slice %93 {offsets = [14, 0], sizes = [2, 256], strides = [1, 1]} : vector<18x256xf32> to vector<2x256xf32>
    %321 = arith.addf %319, %320 : vector<2x256xf32>
    %322 = arith.negf %321 : vector<2x256xf32>
    %323 = math.exp %322 : vector<2x256xf32>
    %cst_108 = arith.constant 1.000000e+00 : f32
    %324 = vector.broadcast %cst_108 : f32 to vector<2x256xf32>
    %325 = arith.addf %324, %323 : vector<2x256xf32>
    %326 = arith.divf %324, %325 : vector<2x256xf32>
    %327 = vector.extract_strided_slice %326 {offsets = [0, 128], sizes = [2, 128], strides = [1, 1]} : vector<2x256xf32> to vector<2x128xf32>
    %328 = vector.extract_strided_slice %321 {offsets = [0, 128], sizes = [2, 128], strides = [1, 1]} : vector<2x256xf32> to vector<2x128xf32>
    %329 = vector.extract_strided_slice %328 {offsets = [0, 64], sizes = [2, 32], strides = [1, 1]} : vector<2x128xf32> to vector<2x32xf32>
    %330 = math.tanh %329 : vector<2x32xf32>
    %331 = vector.extract_strided_slice %327 {offsets = [0, 32], sizes = [2, 32], strides = [1, 1]} : vector<2x128xf32> to vector<2x32xf32>
    %332 = arith.mulf %331, %301 : vector<2x32xf32>
    %333 = vector.extract_strided_slice %327 {offsets = [0, 0], sizes = [2, 32], strides = [1, 1]} : vector<2x128xf32> to vector<2x32xf32>
    %334 = arith.mulf %333, %330 : vector<2x32xf32>
    %335 = arith.addf %332, %334 : vector<2x32xf32>
    %336 = vector.extract_strided_slice %327 {offsets = [0, 96], sizes = [2, 32], strides = [1, 1]} : vector<2x128xf32> to vector<2x32xf32>
    %337 = math.tanh %335 : vector<2x32xf32>
    %338 = arith.mulf %336, %337 : vector<2x32xf32>
    %339 = vector.extract_strided_slice %326 {offsets = [0, 0], sizes = [2, 128], strides = [1, 1]} : vector<2x256xf32> to vector<2x128xf32>
    %340 = vector.extract_strided_slice %321 {offsets = [0, 0], sizes = [2, 128], strides = [1, 1]} : vector<2x256xf32> to vector<2x128xf32>
    %341 = vector.extract_strided_slice %340 {offsets = [0, 64], sizes = [2, 32], strides = [1, 1]} : vector<2x128xf32> to vector<2x32xf32>
    %342 = math.tanh %341 : vector<2x32xf32>
    %343 = vector.extract_strided_slice %339 {offsets = [0, 32], sizes = [2, 32], strides = [1, 1]} : vector<2x128xf32> to vector<2x32xf32>
    %344 = arith.mulf %343, %313 : vector<2x32xf32>
    %345 = vector.extract_strided_slice %339 {offsets = [0, 0], sizes = [2, 32], strides = [1, 1]} : vector<2x128xf32> to vector<2x32xf32>
    %346 = arith.mulf %345, %342 : vector<2x32xf32>
    %347 = arith.addf %344, %346 : vector<2x32xf32>
    %348 = vector.extract_strided_slice %339 {offsets = [0, 96], sizes = [2, 32], strides = [1, 1]} : vector<2x128xf32> to vector<2x32xf32>
    %349 = math.tanh %347 : vector<2x32xf32>
    %350 = arith.mulf %348, %349 : vector<2x32xf32>
    %351 = tpu.concatenate %350, %338 in 1 : vector<2x32xf32>, vector<2x32xf32> -> vector<2x64xf32>
    %352 = arith.truncf %351 : vector<2x64xf32> to vector<2x64xbf16>
    %cst_109 = arith.constant dense<0.000000e+00> : vector<2x256xf32>
    %353 = tpu.matmul %352, %87, %cst_109 {dimension_numbers = #tpu.dot_dimension_numbers<[1], [0], [0], [1], [0, 0, 1, 1], [], []>} : vector<2x64xbf16>, vector<64x256xbf16>, vector<2x256xf32> -> vector<2x256xf32>
    %354 = vector.extract_strided_slice %93 {offsets = [16, 0], sizes = [2, 256], strides = [1, 1]} : vector<18x256xf32> to vector<2x256xf32>
    %355 = arith.addf %353, %354 : vector<2x256xf32>
    %356 = arith.negf %355 : vector<2x256xf32>
    %357 = math.exp %356 : vector<2x256xf32>
    %cst_110 = arith.constant 1.000000e+00 : f32
    %358 = vector.broadcast %cst_110 : f32 to vector<2x256xf32>
    %359 = arith.addf %358, %357 : vector<2x256xf32>
    %360 = arith.divf %358, %359 : vector<2x256xf32>
    %361 = vector.extract_strided_slice %360 {offsets = [0, 128], sizes = [2, 128], strides = [1, 1]} : vector<2x256xf32> to vector<2x128xf32>
    %362 = vector.extract_strided_slice %355 {offsets = [0, 128], sizes = [2, 128], strides = [1, 1]} : vector<2x256xf32> to vector<2x128xf32>
    %363 = vector.extract_strided_slice %362 {offsets = [0, 64], sizes = [2, 32], strides = [1, 1]} : vector<2x128xf32> to vector<2x32xf32>
    %364 = math.tanh %363 : vector<2x32xf32>
    %365 = vector.extract_strided_slice %361 {offsets = [0, 32], sizes = [2, 32], strides = [1, 1]} : vector<2x128xf32> to vector<2x32xf32>
    %366 = arith.mulf %365, %335 : vector<2x32xf32>
    %367 = vector.extract_strided_slice %361 {offsets = [0, 0], sizes = [2, 32], strides = [1, 1]} : vector<2x128xf32> to vector<2x32xf32>
    %368 = arith.mulf %367, %364 : vector<2x32xf32>
    %369 = arith.addf %366, %368 : vector<2x32xf32>
    %370 = vector.extract_strided_slice %361 {offsets = [0, 96], sizes = [2, 32], strides = [1, 1]} : vector<2x128xf32> to vector<2x32xf32>
    %371 = math.tanh %369 : vector<2x32xf32>
    %372 = arith.mulf %370, %371 : vector<2x32xf32>
    %373 = arith.truncf %372 : vector<2x32xf32> to vector<2x32xbf16>
    %c0_111 = arith.constant 0 : index
    %c0_112 = arith.constant 0 : index
    %374 = vector.load %arg7[%c0_111, %c0_112] : memref<32x640xbf16, #tpu.memory_space<vmem>>, vector<32x640xbf16>
    %cst_113 = arith.constant dense<0.000000e+00> : vector<2x640xf32>
    %375 = tpu.matmul %373, %374, %cst_113 {dimension_numbers = #tpu.dot_dimension_numbers<[1], [0], [0], [1], [0, 0, 1, 1], [], []>} : vector<2x32xbf16>, vector<32x640xbf16>, vector<2x640xf32> -> vector<2x640xf32>
    %c0_114 = arith.constant 0 : index
    %c0_115 = arith.constant 0 : index
    %376 = vector.load %arg8[%c0_114, %c0_115] : memref<1x640xf32, #tpu.memory_space<vmem>>, vector<1x640xf32>
    %377 = vector.broadcast %376 : vector<1x640xf32> to vector<2x640xf32>
    %378 = arith.addf %375, %377 : vector<2x640xf32>
    %379 = arith.negf %378 : vector<2x640xf32>
    %380 = math.exp %379 : vector<2x640xf32>
    %cst_116 = arith.constant 1.000000e+00 : f32
    %381 = vector.broadcast %cst_116 : f32 to vector<2x640xf32>
    %382 = arith.addf %381, %380 : vector<2x640xf32>
    %383 = arith.divf %381, %382 : vector<2x640xf32>
    %c0_117 = arith.constant 0 : index
    %c0_118 = arith.constant 0 : index
    %384 = vector.load %arg9[%c0_117, %c0_118] : memref<2x640xf32, #tpu.memory_space<vmem>>, vector<2x640xf32>
    tpu.vector_store %arg9[%c0_117, %c0_118], %383 {strides = array<i32>} : memref<2x640xf32, #tpu.memory_space<vmem>>, vector<2x640xf32>,
    return
  }
  func.func @transform_0(%arg0: i32, %arg1: memref<2x8xi32, #tpu.memory_space<smem>>) -> (i32, i32, i32) {
    %c0_i32 = arith.constant 0 : i32
    %c0_i32_0 = arith.constant 0 : i32
    %c0_i32_1 = arith.constant 0 : i32
    %c0_i32_2 = arith.constant 0 : i32
    return %c0_i32, %c0_i32_0, %c0_i32_1 : i32, i32, i32
  }
  func.func @transform_1(%arg0: i32, %arg1: memref<2x8xi32, #tpu.memory_space<smem>>) -> (i32, i32) {
    %c0_i32 = arith.constant 0 : i32
    %c0_i32_0 = arith.constant 0 : i32
    %c0_i32_1 = arith.constant 0 : i32
    return %c0_i32, %c0_i32_0 : i32, i32
  }
  func.func @transform_2(%arg0: i32, %arg1: memref<2x8xi32, #tpu.memory_space<smem>>) -> (i32, i32) {
    %c0_i32 = arith.constant 0 : i32
    %c0_i32_0 = arith.constant 0 : i32
    %c0_i32_1 = arith.constant 0 : i32
    return %c0_i32, %c0_i32_0 : i32, i32
  }
  func.func @transform_3(%arg0: i32, %arg1: memref<2x8xi32, #tpu.memory_space<smem>>) -> (i32, i32) {
    %c0_i32 = arith.constant 0 : i32
    %c0_i32_0 = arith.constant 0 : i32
    %c0_i32_1 = arith.constant 0 : i32
    return %c0_i32, %c0_i32_0 : i32, i32
  }
  func.func @transform_4(%arg0: i32, %arg1: memref<2x8xi32, #tpu.memory_space<smem>>) -> (i32, i32) {
    %c0_i32 = arith.constant 0 : i32
    %c0_i32_0 = arith.constant 0 : i32
    %c0_i32_1 = arith.constant 0 : i32
    return %c0_i32, %c0_i32_0 : i32, i32
  }
  func.func @transform_5(%arg0: i32, %arg1: memref<2x8xi32, #tpu.memory_space<smem>>) -> (i32, i32) {
    %c0_i32 = arith.constant 0 : i32
    %c0_i32_0 = arith.constant 0 : i32
    %c0_i32_1 = arith.constant 0 : i32
    return %c0_i32, %c0_i32_0 : i32, i32
  }
  func.func @transform_6(%arg0: i32, %arg1: memref<2x8xi32, #tpu.memory_space<smem>>) -> (i32, i32) {
    %c0_i32 = arith.constant 0 : i32
    %c0_i32_0 = arith.constant 0 : i32
    %c0_i32_1 = arith.constant 0 : i32
    return %c0_i32, %c0_i32_0 : i32, i32
  }
  func.func @transform_7(%arg0: i32, %arg1: memref<2x8xi32, #tpu.memory_space<smem>>) -> (i32, i32) {
    %c0_i32 = arith.constant 0 : i32
    %c0_i32_0 = arith.constant 0 : i32
    %c0_i32_1 = arith.constant 0 : i32
    return %c0_i32, %c0_i32_0 : i32, i32
  }
}

</mosaic_0001>

<bundles_post_ra>
// kernel: my_model_forward.1
= control target key start
LH: loop header
LB: loop body
LE: loop exit
PB: predicated region body
PF: predicated region fallthrough
CT: control target
= control target key end

     0   :  { %s2031_s30 = smov [#allocation4]   ;;  %s2435_s0 = inlined_call_operand.hbm [shape: s32[2,8], index: 0, kind: input, shape index: {}]   ;;  %s2436_s1 = inlined_call_operand.hbm [shape: f32[20,1,64], index: 1, kind: input, shape index: {}]   ;;  %s2437_s2 = inlined_call_operand.hbm [shape: bf16[64,128], index: 2, kind: input, shape index: {}]   ;;  %s2438_s3 = inlined_call_operand.hbm [shape: f32[1,128], index: 3, kind: input, shape index: {}]   ;;  %s2439_s4 = inlined_call_operand.hbm [shape: bf16[64,256], index: 4, kind: input, shape index: {}]   ;;  %s2440_s5 = inlined_call_operand.vmem [shape: f32[1,128], index: 5, kind: input, shape index: {}]   ;;  %s2441_s6 = inlined_call_operand.hbm [shape: bf16[32,640], index: 6, kind: input, shape index: {}]   ;;  %s2442_s7 = inlined_call_operand.hbm [shape: f32[1,640], index: 7, kind: input, shape index: {}]   ;;  %s2443_s8 = inlined_call_operand.hbm [shape: f32[2,640], index: 8, kind: output, shape index: {}]  }
   0x1   :  { %s14_s29 = sshll.u32 %s2435_s0, 4  ;;  %s15_s29 = int_to_ptr.hbm [resolvable:$true] %s14_s29 }
   0x2   :  { %17 = dma.hbm_to_smem %s15_s29, 32, %s2031_s30, [#allocation3] }
   0x3   :  { %2019 = dma.done.wait [#allocation3], 32 }
   0x4   :  { %2020 = vsyncadd [#allocation3], 4294967264 }
   0x5   :  { %20 = sfence }
   0x6   :  { %21 = vsyncpa [#allocation6], 0 }
   0x7   :  { %22 = vsyncpa [#allocation9], 0 }
   0x8   :  { %23 = vsyncpa [#allocation12], 0 }
   0x9   :  { %24 = vsyncpa [#allocation15], 0  ;;  %s43_s11 = sshll.u32 %s2437_s2, 4  ;;  %s44_s11 = int_to_ptr.hbm [resolvable:$true] %s43_s11 }
   0xa   :  { %25 = vsyncpa [#allocation7], 0  ;;  %s2032_s12 = smov [#allocation8]   ;;  %s67_s15 = sshll.u32 %s2439_s4, 4  ;;  %s68_s15 = int_to_ptr.hbm [resolvable:$true] %s67_s15 }
   0xb   :  { %s45_s13 = sshll.u32 %s2032_s12, 4  ;;  %s2033_s16 = smov 64   ;;  %s46_s13 = int_to_ptr.vmem [resolvable:$true] %s45_s13 }
   0xc   :  { %s2034_s17 = smov 4   ;;  %s2035_s18 = smov [#allocation11]  }
   0xd   :  { %51 = dma.hbm_to_vmem [thread:$0]  %s44_s11, 512, %s46_s13, [#allocation9], %s2033_s16, %s2033_s16, %s2034_s17  }
   0xe   :  { %s69_s19 = sshll.u32 %s2035_s18, 4  ;;  %s2036_s20 = smov 128   ;;  %s70_s19 = int_to_ptr.vmem [resolvable:$true] %s69_s19 }
   0xf   :  { %s2037_s2 = smov 8   ;;  %s30_s23 = sshll.u32 %s2436_s1, 4  ;;  %s31_s23 = int_to_ptr.hbm [resolvable:$true] %s30_s23 }
  0x10   :  { %75 = dma.hbm_to_vmem [thread:$0]  %s68_s15, 1024, %s70_s19, [#allocation12], %s2036_s20, %s2036_s20, %s2037_s2  }
  0x11   :  { %s2038_s24 = smov [#allocation5]   ;;  %s57_s27 = sshll.u32 %s2438_s3, 4  ;;  %s58_s27 = int_to_ptr.hbm [resolvable:$true] %s57_s27 }
  0x12   :  { %s32_s25 = sshll.u32 %s2038_s24, 4  ;;  %s2039_s28 = smov 16   ;;  %s33_s25 = int_to_ptr.vmem [resolvable:$true] %s32_s25 }
  0x13   :  { %s2040_s29 = smov 1   ;;  %s2041_s30 = smov [#allocation10]  }
  0x14   :  { %38 = dma.hbm_to_vmem [thread:$0]  %s31_s23, 320, %s33_s25, [#allocation6], %s2039_s28, %s2039_s28, %s2040_s29  }
  0x15   :  { %s59_s9 = sshll.u32 %s2041_s30, 4  ;;  %s82_s12 = sshll.u32 %s2441_s6, 4  ;;  %s60_s9 = int_to_ptr.vmem [resolvable:$true] %s59_s9  ;;  %s83_s12 = int_to_ptr.hbm [resolvable:$true] %s82_s12 }
  0x16   :  { %62 = dma.hbm_to_vmem [thread:$0]  %s58_s27, 16, %s60_s9, [#allocation9]  }
  0x17   :  { %s2042_s1 = smov [#allocation13]   ;;  %s96_s3 = sshll.u32 %s2442_s7, 4  ;;  %s97_s3 = int_to_ptr.hbm [resolvable:$true] %s96_s3 }
  0x18   :  { %s84_s13 = sshll.u32 %s2042_s1, 4  ;;  %s2043_s15 = smov 320   ;;  %s85_s13 = int_to_ptr.vmem [resolvable:$true] %s84_s13 }
  0x19   :  { %s2044_s17 = smov 20   ;;  %s2045_s18 = smov [#allocation14]  }
  0x1a   :  { %90 = dma.hbm_to_vmem [thread:$0]  %s83_s12, 1280, %s85_s13, [#allocation12], %s2043_s15, %s2043_s15, %s2044_s17  }
  0x1b   :  { %s98_s19 = sshll.u32 %s2045_s18, 4  ;;  %s99_s19 = int_to_ptr.vmem [resolvable:$true] %s98_s19 }
  0x1c   :  { %101 = dma.hbm_to_vmem [thread:$0]  %s97_s3, 80, %s99_s19, [#allocation15]  }
  0x1d   :  { %2021 = dma.done.wait [#allocation6], 320  }
  0x1e   :  { %2022 = vsyncadd [#allocation6], 4294966976 }
  0x1f   :  { %2023 = dma.done.wait [#allocation9], 528  }
  0x20   :  { %2024 = vsyncadd [#allocation9], 4294966768 }
  0x21   :  { %2025 = dma.done.wait [#allocation12], 2304  }
  0x22   :  { %2026 = vsyncadd [#allocation12], 4294964992 }
  0x23   :  { %2027 = dma.done.wait [#allocation15], 80  }
  0x24   :  { %2028 = vsyncadd [#allocation15], 4294967216  ;;  %s127_s6 = sld [smem:[#allocation4]]  ;;  %vm130_vm0 = vcmask 516096   ;;  %v1652_v0 = vld [vmem:[#allocation8 + $0x18] sm:$0xff]  ;;  %v1651_v2 = vld [vmem:[#allocation8 + $0x10] sm:$0xff] }
  0x25   :  { %s1504_s20 = sld [smem:[#allocation4 + $0x80]]  ;;  %239 = vmatpush.bf16.msra.mxu0 %v1652_v0  ;;  %v1650_v7 = vld [vmem:[#allocation8 + $0x8] sm:$0xff]  ;;  %v1649_v11 = vld [vmem:[#allocation8] sm:$0xff]  ;;  %vm231_vm1 = vcmask 523264   ;;  %v1563_v46 = vld [vmem:[#allocation11 + $0x30] sm:$0xf] }
  0x26   :  { %s1505_s2 = sld [smem:[#allocation4 + $0x1]]  ;;  %v2133_v23 = vld [vmem:[#allocation10] ss:$0 sm:$0xff]  ;;  %v1660_v47 = vld [vmem:[#allocation11 + $0x34] sm:$0xf0]  ;;  %vm302_vm6 = vcmask 261120  }
  0x27   :  { %s1506_s7 = sld [smem:[#allocation4 + $0x81]]  ;;  %v1659_v48 = vld [vmem:[#allocation11 + $0x34] sm:$0xf]  ;;  %v2146_v49 = vor.u32 %v1660_v47, %v1563_v46  ;;  %v1565_v50 = vld [vmem:[#allocation11 + $0x38] sm:$0xf0] }
  0x28   :  { %s1507_s21 = sld [smem:[#allocation4 + $0x2]]  ;;  %v1555_v51 = vld [vmem:[#allocation11 + $0x20] sm:$0xf]  ;;  %v1658_v52 = vld [vmem:[#allocation11 + $0x24] sm:$0xf0]  ;;  %v2148_v53 = vor.u32 %v1659_v48, %v1565_v50 }
  0x29   :  { %s1508_s22 = sld [smem:[#allocation4 + $0x82]]  ;;  %240 = vmatpush.bf16.msra.mxu0 %v1651_v2  ;;  %v1657_v54 = vld [vmem:[#allocation11 + $0x24] sm:$0xf]  ;;  %v1557_v55 = vld [vmem:[#allocation11 + $0x28] sm:$0xf0]  ;;  %357 = vmatpush.bf16.msra.mxu1 %v2146_v49  ;;  %v2151_v56 = vor.u32 %v1658_v52, %v1555_v51 }
  0x2a   :  { %s1509_s23 = sld [smem:[#allocation4 + $0x3]]  ;;  %s128_s24 = scalar_lea.vmem [#allocation5], %s127_s6  ;;  %474 = vmatpush.bf16.msra.mxu3 %v2146_v49  ;;  %370 = vmatpush.bf16.msra.mxu2 %v2148_v53  ;;  %v2155_v57 = vor.u32 %v1657_v54, %v1557_v55  ;;  %v1547_v58 = vld [vmem:[#allocation11 + $0x10] sm:$0xf]  ;;  %v1656_v59 = vld [vmem:[#allocation11 + $0x14] sm:$0xf0] }
  0x2b   :  { %v129_v1 = vld [vmem:[%s128_s24] sm:$0x1]  ;;  %s1510_s25 = sld [smem:[#allocation4 + $0x83]]  ;;  %s133_s4 = scalar_lea.vmem [#allocation5], %s1504_s20  ;;  %v1655_v60 = vld [vmem:[#allocation11 + $0x14] sm:$0xf]  ;;  %v2159_v62 = vor.u32 %v1656_v59, %v1547_v58 }
  0x2c   :  { %131 = vst.msk [vmem:[#allocation2] sm:$0x1] %vm130_vm0, %v129_v1  ;;  %v134_v3 = vld [vmem:[%s133_s4] sm:$0x1]  ;;  %s137_s26 = scalar_lea.vmem [#allocation5], %s1505_s2  ;;  %s1511_s10 = sld [smem:[#allocation4 + $0x4]] }
  0x2d   :  { %135 = vst.msk [vmem:[#allocation2 + $0x1] sm:$0x1] %vm130_vm0, %v134_v3  ;;  %v138_v4 = vld [vmem:[%s137_s26] sm:$0x1]  ;;  %s141_s27 = scalar_lea.vmem [#allocation5], %s1506_s7  ;;  %s1512_s11 = sld [smem:[#allocation4 + $0x84]]  ;;  %241 = vmatpush.bf16.msra.mxu0 %v1650_v7  ;;  %358 = vmatpush.bf16.msra.mxu1 %v2151_v56 }
  0x2e   :  { %139 = vst.msk [vmem:[#allocation2 + $0x2] sm:$0x1] %vm130_vm0, %v138_v4  ;;  %v142_v5 = vld [vmem:[%s141_s27] sm:$0x1]  ;;  %s145_s28 = scalar_lea.vmem [#allocation5], %s1507_s21  ;;  %s1513_s12 = sld [smem:[#allocation4 + $0x5]]  ;;  %475 = vmatpush.bf16.msra.mxu3 %v2151_v56  ;;  %371 = vmatpush.bf16.msra.mxu2 %v2155_v57 }
  0x2f   :  { %143 = vst.msk [vmem:[#allocation2 + $0x3] sm:$0x1] %vm130_vm0, %v142_v5  ;;  %v146_v6 = vld [vmem:[%s145_s28] sm:$0x1]  ;;  %s149_s29 = scalar_lea.vmem [#allocation5], %s1508_s22  ;;  %s1514_s1 = sld [smem:[#allocation4 + $0x85]] }
  0x30   :  { %147 = vst.msk [vmem:[#allocation2 + $0x4] sm:$0x1] %vm130_vm0, %v146_v6  ;;  %v150_v8 = vld [vmem:[%s149_s29] sm:$0x1]  ;;  %s153_s30 = scalar_lea.vmem [#allocation5], %s1509_s23  ;;  %s1515_s13 = sld [smem:[#allocation4 + $0x6]] }
  0x31   :  { %151 = vst.msk [vmem:[#allocation2 + $0x5] sm:$0x1] %vm130_vm0, %v150_v8  ;;  %v154_v9 = vld [vmem:[%s153_s30] sm:$0x1]  ;;  %s157_s9 = scalar_lea.vmem [#allocation5], %s1510_s25  ;;  %s1516_s0 = sld [smem:[#allocation4 + $0x86]]  ;;  %242 = vmatpush.bf16.msra.mxu0 %v1649_v11  ;;  %359 = vmatpush.bf16.msra.mxu1 %v2159_v62 }
  0x32   :  { %155 = vst.msk [vmem:[#allocation2 + $0x6] sm:$0x1] %vm130_vm0, %v154_v9  ;;  %v158_v10 = vld [vmem:[%s157_s9] sm:$0x1]  ;;  %s1517_s14 = sld [smem:[#allocation4 + $0x7]]  ;;  %s161_s3 = scalar_lea.vmem [#allocation5], %s1511_s10  ;;  %476 = vmatpush.bf16.msra.mxu3 %v2159_v62 }
  0x33   :  { %159 = vst.msk [vmem:[#allocation2 + $0x7] sm:$0x1] %vm130_vm0, %v158_v10  ;;  %v162_v12 = vld [vmem:[%s161_s3] sm:$0x1]  ;;  %s1518_s15 = sld [smem:[#allocation4 + $0x87]]  ;;  %s165_s17 = scalar_lea.vmem [#allocation5], %s1512_s11 }
  0x34   :  { %163 = vst.msk [vmem:[#allocation2 + $0x8] sm:$0x1] %vm130_vm0, %v162_v12  ;;  %v166_v13 = vld [vmem:[%s165_s17] sm:$0x1]  ;;  %s169_s18 = scalar_lea.vmem [#allocation5], %s1513_s12  ;;  %s2046_s21 = smov 32  }
  0x35   :  { %167 = vst.msk [vmem:[#allocation2 + $0x9] sm:$0x1] %vm130_vm0, %v166_v13  ;;  %v170_v14 = vld [vmem:[%s169_s18] sm:$0x1]  ;;  %s173_s19 = scalar_lea.vmem [#allocation5], %s1514_s1  ;;  %487 = vmatpush.bf16.msrb.mxu0 %v2148_v53  ;;  %s1475_s27 = sshll.u32 %s2443_s8, 4  ;;  %s1476_s27 = int_to_ptr.hbm [resolvable:$true] %s1475_s27 }
  0x36   :  { %171 = vst.msk [vmem:[#allocation2 + $0xa] sm:$0x1] %vm130_vm0, %v170_v14  ;;  %v174_v15 = vld [vmem:[%s173_s19] sm:$0x1]  ;;  %s177_s6 = scalar_lea.vmem [#allocation5], %s1515_s13 }
  0x37   :  { %175 = vst.msk [vmem:[#allocation2 + $0xb] sm:$0x1] %vm130_vm0, %v174_v15  ;;  %v178_v16 = vld [vmem:[%s177_s6] sm:$0x1]  ;;  %s181_s20 = scalar_lea.vmem [#allocation5], %s1516_s0 }
  0x38   :  { %179 = vst.msk [vmem:[#allocation2 + $0xc] sm:$0x1] %vm130_vm0, %v178_v16  ;;  %v182_v17 = vld [vmem:[%s181_s20] sm:$0x1]  ;;  %s185_s2 = scalar_lea.vmem [#allocation5], %s1517_s14 }
  0x39   :  { %183 = vst.msk [vmem:[#allocation2 + $0xd] sm:$0x1] %vm130_vm0, %v182_v17  ;;  %v186_v18 = vld [vmem:[%s185_s2] sm:$0x1]  ;;  %s189_s7 = scalar_lea.vmem [#allocation5], %s1518_s15  ;;  %488 = vmatpush.bf16.msrb.mxu0 %v2155_v57 }
  0x3a   :  { %187 = vst.msk [vmem:[#allocation2 + $0xe] sm:$0x1] %vm130_vm0, %v186_v18  ;;  %v190_v19 = vld [vmem:[%s189_s7] sm:$0x1]  ;;  %v1549_v61 = vld [vmem:[#allocation11 + $0x18] sm:$0xf0] }
  0x3b   :  { %191 = vst.msk [vmem:[#allocation2 + $0xf] sm:$0x1] %vm130_vm0, %v190_v19  ;;  %v192_v20 = vld [vmem:[#allocation2] sm:$0xff]  ;;  %v2163_v63 = vor.u32 %v1655_v60, %v1549_v61  ;;  %v1654_v3 = vld [vmem:[#allocation11 + $0x4] sm:$0xf0] }
  0x3c   :  { %v1539_v2 = vld [vmem:[#allocation11] sm:$0xf]  ;;  %v1653_v4 = vld [vmem:[#allocation11 + $0x4] sm:$0xf]  ;;  %v1541_v6 = vld [vmem:[#allocation11 + $0x8] sm:$0xf0] }
  0x3d   :  { %372 = vmatpush.bf16.msra.mxu2 %v2163_v63  ;;  %489 = vmatpush.bf16.msrb.mxu0 %v2163_v63  ;;  %v2171_v5 = vor.u32 %v1654_v3, %v1539_v2  ;;  %v2173_v7 = vor.u32 %v1653_v4, %v1541_v6  ;;  %v2209_v11 = vld [vmem:[%s2440_s5] ss:$0 sm:$0xff] }
  0x3e   :  { %v347_v13 = vrot.slane %v2209_v11, 2 }
  0x3f   :  { %360 = vmatpush.bf16.msra.mxu1 %v2171_v5  ;;  %477 = vmatpush.bf16.msra.mxu3 %v2171_v5 }
  0x41   :  { %373 = vmatpush.bf16.msra.mxu2 %v2173_v7  ;;  %490 = vmatpush.bf16.msrb.mxu0 %v2173_v7 }
  0x42   :  { %v193_v21 = vld [vmem:[#allocation2 + $0x8] sm:$0xff] }
  0x43   :  { %v194_v22 = vpack.c.bf16 %v193_v21, %v192_v20  ;;  %591 = vmatpush.bf16.msrb.mxu1 %v2146_v49  ;;  %704 = vmatpush.bf16.msrb.mxu3 %v2146_v49 }
  0x45   :  { %1535 = vmatmul.msk.bf16.vlgmr.msra.gmra.mxu0 %vm231_vm1, %v194_v22  ;;  %604 = vmatpush.bf16.msrb.mxu2 %v2148_v53 }
  0x46   :  { %717 = vmatpush.bf16.msra.mxu0 %v2148_v53 }
  0x47   :  { %592 = vmatpush.bf16.msrb.mxu1 %v2151_v56  ;;  %705 = vmatpush.bf16.msrb.mxu3 %v2151_v56 }
  0x49   :  { %605 = vmatpush.bf16.msrb.mxu2 %v2155_v57 }
  0x4a   :  { %718 = vmatpush.bf16.msra.mxu0 %v2155_v57 }
  0x4b   :  { %593 = vmatpush.bf16.msrb.mxu1 %v2159_v62  ;;  %706 = vmatpush.bf16.msrb.mxu3 %v2159_v62 }
  0x4d   :  { %606 = vmatpush.bf16.msrb.mxu2 %v2163_v63 }
  0x4e   :  { %719 = vmatpush.bf16.msra.mxu0 %v2163_v63 }
  0x4f   :  { %594 = vmatpush.bf16.msrb.mxu1 %v2171_v5  ;;  %707 = vmatpush.bf16.msrb.mxu3 %v2171_v5 }
  0x51   :  { %607 = vmatpush.bf16.msrb.mxu2 %v2173_v7 }
  0x52   :  { %720 = vmatpush.bf16.msra.mxu0 %v2173_v7 }
  0xc2   :  { %v244_v24 = vpop.f32.mrf.mxu0 }
  0xc3   :  { %v2136_v25 = vadd.f32 %v2133_v23, %v244_v24 }
  0xc5   :  { %1690 = vtanh.f32 %v2136_v25  ;;  %v1536_v27 = vmul.f32 -1.442695, %v2136_v25  ;;  %v346_v17 = vrot.slane %v2136_v25, 2 }
  0xc7   :  { %1692 = vpow2.f32 %v1536_v27 }
  0xcb   :  { %v1691_v26 = vpop.eup %1690 }
  0xcc   :  { %283 = vrot.lane.b32.xlu0 %v1691_v26, %s2033_s16 }
  0xcd   :  { %v1693_v28 = vpop.eup %1692 }
  0xce   :  { %v264_v29 = vadd.f32 1.0, %v1693_v28 }
  0xd0   :  { %1694 = vrcp.f32 %v264_v29  ;;  %v276_v35 = vand.u32 2147483648, %v264_v29  ;;  %vm270_vm3 = vweird.f32 %v264_v29  ;;  %v274_v36 = vand.u32 2147483647, %v264_v29 }
  0xd2   :  { %v277_v38 = vor.u32 1.1754944e-38, %v276_v35  ;;  %vm275_vm5 = vcmp.eq.f32.partialorder %v274_v36, 8.507059e+37 }
  0xd6   :  { %v1695_v30 = vpop.eup %1694 }
  0xd7   :  { %v266_v31 = vmul.f32 %v1695_v30, %v264_v29  ;;  %vm271_vm2 = vweird.f32 %v1695_v30 }
  0xd8   :  { %vm272_vm4 = vmor %vm270_vm3, %vm271_vm2 }
  0xd9   :  { %v267_v32 = vsub.f32 1.0, %v266_v31 }
  0xdb   :  { %v268_v33 = vmul.f32 %v1695_v30, %v267_v32 }
  0xdd   :  { %v269_v34 = vadd.f32 %v1695_v30, %v268_v33 }
  0xdf   :  { %v273_v37 = vsel %vm272_vm4, %v1695_v30, %v269_v34 }
  0xe0   :  { %v278_v40 = vsel %vm275_vm5, %v277_v38, %v273_v37 }
  0xe1   :  { %v281_v42 = vmul.f32 0.0, %v278_v40 }
 0x13e   :  { %v284_v39 = vpop.permute.xlu0 %283 }
 0x13f   :  { %v286_v41 = vmul.f32 %v284_v39, %v278_v40 }
 0x141   :  { %288 = vrot.lane.b32.xlu0 %v286_v41, %s2046_s21 }
 0x1b3   :  { %v289_v43 = vpop.permute.xlu0 %288 }
 0x1b4   :  { %v2142_v44 = vadd.f32 %v289_v43, %v281_v42 }
 0x1b6   :  { %1696 = vtanh.f32 %v2142_v44 }
 0x1bc   :  { %v1697_v45 = vpop.eup %1696 }
 0x1bd   :  { %294 = vrot.lane.b32.xlu1 %v1697_v45, %s2033_s16 }
 0x22f   :  { %v295_v0 = vpop.permute.xlu1 %294 }
 0x230   :  { %v297_v1 = vmul.f32 %v295_v0, %v278_v40 }
 0x232   :  { %299 = vrot.lane.b32.xlu1 %v297_v1, %s2046_s21 }
 0x2a4   :  { %v300_v8 = vpop.permute.xlu1 %299 }
 0x2a5   :  { %v303_v9 = vsel %vm302_vm6, %v300_v8, 0.0 }
 0x2a6   :  { %v304_v10 = vpack.c.bf16 %v303_v9, %v303_v9 }
 0x2a8   :  { %1569 = vmatmul.msk.bf16.vlgmr.msra.gmra.mxu1 %vm231_vm1, %v304_v10  ;;  %1570 = vmatmul.msk.bf16.vlgmr.msra.gmra.mxu2 %vm231_vm1, %v304_v10 }
 0x2a9   :  { %833 = vmatpush.bf16.msra.mxu2 %v2148_v53  ;;  %820 = vmatpush.bf16.msra.mxu1 %v2146_v49 }
 0x2ad   :  { %834 = vmatpush.bf16.msra.mxu2 %v2155_v57  ;;  %821 = vmatpush.bf16.msra.mxu1 %v2151_v56 }
 0x2b1   :  { %835 = vmatpush.bf16.msra.mxu2 %v2163_v63  ;;  %822 = vmatpush.bf16.msra.mxu1 %v2159_v62 }
 0x2b5   :  { %836 = vmatpush.bf16.msra.mxu2 %v2173_v7  ;;  %823 = vmatpush.bf16.msra.mxu1 %v2171_v5 }
 0x325   :  { %v362_v12 = vpop.f32.mrf.mxu1 }
 0x326   :  { %v363_v18 = vadd.f32 %v362_v12, %v346_v17  ;;  %v464_v17 = vrot.slane %v2209_v11, 4 }
 0x328   :  { %v1571_v24 = vmul.f32 -1.442695, %v363_v18 }
 0x32b   :  { %v375_v14 = vpop.f32.mrf.mxu2 }
 0x32c   :  { %v376_v15 = vadd.f32 %v375_v14, %v347_v13 }
 0x32d   :  { %v364_v16 = vpop.f32.mrf.mxu1 }
 0x32e   :  { %1698 = vtanh.f32 %v376_v15  ;;  %v1572_v22 = vmul.f32 -1.442695, %v376_v15  ;;  %v2241_v16 = vpop.f32.mrf.mxu0 }
 0x32f   :  { %1700 = vtanh.f32 %v363_v18 }
 0x330   :  { %1702 = vpow2.f32 %v1572_v22 }
 0x331   :  { %1704 = vpow2.f32 %v1571_v24 }
 0x333   :  { %v377_v19 = vpop.f32.mrf.mxu2 }
 0x334   :  { %v1699_v20 = vpop.eup %1698 }
 0x335   :  { %420 = vrot.lane.b32.xlu2 %v1699_v20, %s2033_s16  ;;  %v1701_v21 = vpop.eup %1700  ;;  %v463_v20 = vrot.slane %v2136_v25, 4 }
 0x336   :  { %v1703_v26 = vpop.eup %1702 }
 0x337   :  { %v386_v27 = vadd.f32 1.0, %v1703_v26  ;;  %v1705_v28 = vpop.eup %1704 }
 0x338   :  { %v385_v29 = vadd.f32 1.0, %v1705_v28 }
 0x339   :  { %1706 = vrcp.f32 %v386_v27  ;;  %v413_v38 = vand.u32 2147483648, %v386_v27  ;;  %vm407_vm8 = vweird.f32 %v386_v27  ;;  %v411_v39 = vand.u32 2147483647, %v386_v27 }
 0x33a   :  { %1708 = vrcp.f32 %v385_v29  ;;  %v398_v48 = vand.u32 2147483648, %v385_v29  ;;  %vm392_vm12 = vweird.f32 %v385_v29  ;;  %v396_v50 = vand.u32 2147483647, %v385_v29 }
 0x33b   :  { %v414_v42 = vor.u32 1.1754944e-38, %v413_v38  ;;  %vm412_vm10 = vcmp.eq.f32.partialorder %v411_v39, 8.507059e+37 }
 0x33c   :  { %v399_v52 = vor.u32 1.1754944e-38, %v398_v48  ;;  %vm397_vm14 = vcmp.eq.f32.partialorder %v396_v50, 8.507059e+37 }
 0x33d   :  { %438 = vrot.lane.b32.xlu2 %v1701_v21, %s2033_s16 }
 0x33f   :  { %v1707_v30 = vpop.eup %1706 }
 0x340   :  { %v403_v31 = vmul.f32 %v1707_v30, %v386_v27  ;;  %v1709_v33 = vpop.eup %1708  ;;  %vm408_vm7 = vweird.f32 %v1707_v30 }
 0x341   :  { %v388_v35 = vmul.f32 %v1709_v33, %v385_v29  ;;  %vm409_vm9 = vmor %vm407_vm8, %vm408_vm7  ;;  %vm393_vm11 = vweird.f32 %v1709_v33 }
 0x342   :  { %v404_v32 = vsub.f32 1.0, %v403_v31  ;;  %vm394_vm13 = vmor %vm392_vm12, %vm393_vm11 }
 0x343   :  { %v389_v37 = vsub.f32 1.0, %v388_v35 }
 0x344   :  { %v405_v34 = vmul.f32 %v1707_v30, %v404_v32 }
 0x345   :  { %v390_v41 = vmul.f32 %v1709_v33, %v389_v37 }
 0x346   :  { %v406_v36 = vadd.f32 %v1707_v30, %v405_v34 }
 0x347   :  { %v391_v47 = vadd.f32 %v1709_v33, %v390_v41 }
 0x348   :  { %v410_v40 = vsel %vm409_vm9, %v1707_v30, %v406_v36 }
 0x349   :  { %v415_v45 = vsel %vm412_vm10, %v414_v42, %v410_v40  ;;  %v395_v51 = vsel %vm394_vm13, %v1709_v33, %v391_v47 }
 0x34a   :  { %v400_v55 = vsel %vm397_vm14, %v399_v52, %v395_v51  ;;  %v418_v59 = vmul.f32 0.0, %v415_v45 }
 0x34b   :  { %v436_v0 = vmul.f32 %v400_v55, %v2142_v44 }
 0x38f   :  { %v421_v43 = vpop.permute.xlu2 %420 }
 0x390   :  { %v423_v46 = vmul.f32 %v421_v43, %v415_v45 }
 0x392   :  { %425 = vrot.lane.b32.xlu0 %v423_v46, %s2046_s21 }
 0x397   :  { %v439_v54 = vpop.permute.xlu2 %438 }
 0x398   :  { %v441_v58 = vmul.f32 %v439_v54, %v400_v55 }
 0x39a   :  { %443 = vrot.lane.b32.xlu1 %v441_v58, %s2046_s21 }
 0x404   :  { %v426_v60 = vpop.permute.xlu0 %425 }
 0x405   :  { %v2219_v61 = vadd.f32 %v426_v60, %v418_v59 }
 0x407   :  { %1710 = vtanh.f32 %v2219_v61 }
 0x40c   :  { %v444_v1 = vpop.permute.xlu1 %443 }
 0x40d   :  { %v1711_v2 = vpop.eup %1710  ;;  %v2223_v3 = vadd.f32 %v444_v1, %v436_v0 }
 0x40e   :  { %431 = vrot.lane.b32.xlu2 %v1711_v2, %s2033_s16 }
 0x40f   :  { %1712 = vtanh.f32 %v2223_v3 }
 0x415   :  { %v1713_v4 = vpop.eup %1712 }
 0x416   :  { %449 = vrot.lane.b32.xlu0 %v1713_v4, %s2033_s16 }
 0x468   :  { %v432_v6 = vpop.permute.xlu2 %431 }
 0x469   :  { %v434_v8 = vmul.f32 %v432_v6, %v415_v45 }
 0x46b   :  { %458 = vrot.lane.b32.xlu2 %v434_v8, %s2033_s16 }
 0x488   :  { %v450_v9 = vpop.permute.xlu0 %449 }
 0x489   :  { %v452_v10 = vmul.f32 %v450_v9, %v400_v55 }
 0x48b   :  { %454 = vrot.lane.b32.xlu1 %v452_v10, %s2046_s21 }
 0x4c5   :  { %v459_v44 = vpop.permute.xlu2 %458 }
 0x4fd   :  { %v455_v12 = vpop.permute.xlu1 %454 }
 0x4fe   :  { %v461_v14 = vsel %vm302_vm6, %v455_v12, %v459_v44 }
 0x4ff   :  { %v462_v15 = vpack.c.bf16 %v461_v14, %v461_v14 }
 0x501   :  { %1573 = vmatmul.msk.bf16.vlgmr.msra.gmra.mxu3 %vm231_vm1, %v462_v15  ;;  %1574 = vmatmul.msk.bf16.vlgmr.msrb.gmra.mxu0 %vm231_vm1, %v462_v15 }
 0x502   :  { %948 = vmatpush.bf16.msrb.mxu0 %v2148_v53  ;;  %935 = vmatpush.bf16.msra.mxu3 %v2146_v49 }
 0x506   :  { %949 = vmatpush.bf16.msrb.mxu0 %v2155_v57  ;;  %936 = vmatpush.bf16.msra.mxu3 %v2151_v56 }
 0x50a   :  { %950 = vmatpush.bf16.msrb.mxu0 %v2163_v63  ;;  %937 = vmatpush.bf16.msra.mxu3 %v2159_v62 }
 0x50e   :  { %951 = vmatpush.bf16.msrb.mxu0 %v2173_v7  ;;  %938 = vmatpush.bf16.msra.mxu3 %v2171_v5 }
 0x57e   :  { %v492_v18 = vpop.f32.mrf.mxu0 }
 0x57f   :  { %v493_v19 = vadd.f32 %v492_v18, %v464_v17 }
 0x581   :  { %1714 = vtanh.f32 %v493_v19  ;;  %v1576_v29 = vmul.f32 -1.442695, %v493_v19 }
 0x584   :  { %v479_v21 = vpop.f32.mrf.mxu3 }
 0x585   :  { %v480_v22 = vadd.f32 %v479_v21, %v463_v20 }
 0x586   :  { %v494_v24 = vpop.f32.mrf.mxu0 }
 0x587   :  { %v1715_v26 = vpop.eup %1714  ;;  %1716 = vtanh.f32 %v480_v22  ;;  %v1575_v30 = vmul.f32 -1.442695, %v480_v22  ;;  %v580_v24 = vrot.slane %v2136_v25, 6 }
 0x588   :  { %537 = vrot.lane.b32.xlu0 %v1715_v26, %s2033_s16  ;;  %1718 = vpow2.f32 %v1576_v29 }
 0x589   :  { %1720 = vpow2.f32 %v1575_v30 }
 0x58c   :  { %v481_v27 = vpop.f32.mrf.mxu3 }
 0x58d   :  { %v1717_v28 = vpop.eup %1716 }
 0x58e   :  { %555 = vrot.lane.b32.xlu1 %v1717_v28, %s2033_s16  ;;  %v1719_v31 = vpop.eup %1718 }
 0x58f   :  { %v503_v32 = vadd.f32 1.0, %v1719_v31  ;;  %v1721_v33 = vpop.eup %1720 }
 0x590   :  { %v502_v34 = vadd.f32 1.0, %v1721_v33 }
 0x591   :  { %1722 = vrcp.f32 %v503_v32  ;;  %v530_v43 = vand.u32 2147483648, %v503_v32  ;;  %vm524_vm0 = vweird.f32 %v503_v32  ;;  %v528_v45 = vand.u32 2147483647, %v503_v32 }
 0x592   :  { %1724 = vrcp.f32 %v502_v34  ;;  %v515_v54 = vand.u32 2147483648, %v502_v34  ;;  %vm509_vm5 = vweird.f32 %v502_v34  ;;  %v513_v58 = vand.u32 2147483647, %v502_v34 }
 0x593   :  { %v531_v48 = vor.u32 1.1754944e-38, %v530_v43  ;;  %vm529_vm3 = vcmp.eq.f32.partialorder %v528_v45, 8.507059e+37 }
 0x594   :  { %v516_v60 = vor.u32 1.1754944e-38, %v515_v54  ;;  %vm514_vm8 = vcmp.eq.f32.partialorder %v513_v58, 8.507059e+37 }
 0x597   :  { %v1723_v35 = vpop.eup %1722 }
 0x598   :  { %v520_v36 = vmul.f32 %v1723_v35, %v503_v32  ;;  %v1725_v37 = vpop.eup %1724  ;;  %vm525_vm15 = vweird.f32 %v1723_v35 }
 0x599   :  { %v505_v39 = vmul.f32 %v1725_v37, %v502_v34  ;;  %vm526_vm2 = vmor %vm524_vm0, %vm525_vm15  ;;  %vm510_vm4 = vweird.f32 %v1725_v37 }
 0x59a   :  { %v521_v38 = vsub.f32 1.0, %v520_v36  ;;  %vm511_vm7 = vmor %vm509_vm5, %vm510_vm4 }
 0x59b   :  { %v506_v41 = vsub.f32 1.0, %v505_v39 }
 0x59c   :  { %v522_v40 = vmul.f32 %v1723_v35, %v521_v38 }
 0x59d   :  { %v507_v46 = vmul.f32 %v1725_v37, %v506_v41 }
 0x59e   :  { %v523_v42 = vadd.f32 %v1723_v35, %v522_v40 }
 0x59f   :  { %v508_v50 = vadd.f32 %v1725_v37, %v507_v46 }
 0x5a0   :  { %v527_v47 = vsel %vm526_vm2, %v1723_v35, %v523_v42 }
 0x5a1   :  { %v532_v52 = vsel %vm529_vm3, %v531_v48, %v527_v47  ;;  %v512_v59 = vsel %vm511_vm7, %v1725_v37, %v508_v50 }
 0x5a2   :  { %v517_v1 = vsel %vm514_vm8, %v516_v60, %v512_v59  ;;  %v535_v4 = vmul.f32 %v532_v52, %v2219_v61 }
 0x5a3   :  { %v553_v10 = vmul.f32 %v517_v1, %v2223_v3 }
 0x5fa   :  { %v538_v51 = vpop.permute.xlu0 %537 }
 0x5fb   :  { %v540_v55 = vmul.f32 %v538_v51, %v532_v52 }
 0x5fd   :  { %542 = vrot.lane.b32.xlu2 %v540_v55, %s2046_s21 }
 0x600   :  { %v556_v0 = vpop.permute.xlu1 %555 }
 0x601   :  { %v558_v2 = vmul.f32 %v556_v0, %v517_v1 }
 0x603   :  { %560 = vrot.lane.b32.xlu0 %v558_v2, %s2046_s21 }
 0x657   :  { %v543_v6 = vpop.permute.xlu2 %542 }
 0x658   :  { %v2252_v8 = vadd.f32 %v543_v6, %v535_v4 }
 0x65a   :  { %1726 = vtanh.f32 %v2252_v8 }
 0x660   :  { %v1727_v9 = vpop.eup %1726 }
 0x661   :  { %548 = vrot.lane.b32.xlu1 %v1727_v9, %s2033_s16 }
 0x675   :  { %v561_v44 = vpop.permute.xlu0 %560 }
 0x676   :  { %v2257_v12 = vadd.f32 %v561_v44, %v553_v10 }
 0x678   :  { %1728 = vtanh.f32 %v2257_v12 }
 0x67e   :  { %v1729_v14 = vpop.eup %1728 }
 0x67f   :  { %566 = vrot.lane.b32.xlu2 %v1729_v14, %s2033_s16 }
 0x6d3   :  { %v549_v15 = vpop.permute.xlu1 %548 }
 0x6d4   :  { %v551_v61 = vmul.f32 %v549_v15, %v532_v52 }
 0x6d6   :  { %575 = vrot.lane.b32.xlu1 %v551_v61, %s2033_s16 }
 0x6d9   :  { %v567_v18 = vpop.permute.xlu2 %566 }
 0x6da   :  { %v569_v19 = vmul.f32 %v567_v18, %v517_v1 }
 0x6dc   :  { %571 = vrot.lane.b32.xlu0 %v569_v19, %s2046_s21 }
 0x748   :  { %v576_v20 = vpop.permute.xlu1 %575 }
 0x74e   :  { %v572_v21 = vpop.permute.xlu0 %571 }
 0x74f   :  { %v578_v3 = vsel %vm302_vm6, %v572_v21, %v576_v20 }
 0x750   :  { %v579_v22 = vpack.c.bf16 %v578_v3, %v578_v3 }
 0x752   :  { %1577 = vmatmul.msk.bf16.vlgmr.msrb.gmra.mxu1 %vm231_vm1, %v579_v22  ;;  %1578 = vmatmul.msk.bf16.vlgmr.msrb.gmra.mxu2 %vm231_vm1, %v579_v22 }
 0x753   :  { %1050 = vmatpush.bf16.msrb.mxu1 %v2146_v49  ;;  %1063 = vmatpush.bf16.msrb.mxu2 %v2148_v53  ;;  %v581_v49 = vrot.slane %v2209_v11, 6 }
 0x757   :  { %1051 = vmatpush.bf16.msrb.mxu1 %v2151_v56  ;;  %1064 = vmatpush.bf16.msrb.mxu2 %v2155_v57 }
 0x75b   :  { %1052 = vmatpush.bf16.msrb.mxu1 %v2159_v62  ;;  %1065 = vmatpush.bf16.msrb.mxu2 %v2163_v63 }
 0x75f   :  { %1053 = vmatpush.bf16.msrb.mxu1 %v2171_v5  ;;  %1066 = vmatpush.bf16.msrb.mxu2 %v2173_v7 }
 0x7cf   :  { %v596_v26 = vpop.f32.mrf.mxu1 }
 0x7d0   :  { %v597_v27 = vadd.f32 %v596_v26, %v580_v24 }
 0x7d2   :  { %1730 = vtanh.f32 %v597_v27  ;;  %v1579_v33 = vmul.f32 -1.442695, %v597_v27 }
 0x7d5   :  { %v609_v28 = vpop.f32.mrf.mxu2 }
 0x7d6   :  { %v610_v56 = vadd.f32 %v609_v28, %v581_v49  ;;  %v2304_v28 = vadd.f32 %v2133_v23, %v2241_v16 }
 0x7d7   :  { %v598_v29 = vpop.f32.mrf.mxu1 }
 0x7d8   :  { %v1731_v30 = vpop.eup %1730  ;;  %1732 = vtanh.f32 %v610_v56  ;;  %v1580_v31 = vmul.f32 -1.442695, %v610_v56 }
 0x7d9   :  { %672 = vrot.lane.b32.xlu0 %v1731_v30, %s2033_s16 }
 0x7da   :  { %1734 = vpow2.f32 %v1580_v31 }
 0x7dd   :  { %v611_v62 = vpop.f32.mrf.mxu2 }
 0x7de   :  { %v1733_v5 = vpop.eup %1732 }
 0x7df   :  { %654 = vrot.lane.b32.xlu2 %v1733_v5, %s2033_s16 }
 0x7e0   :  { %v1735_v25 = vpop.eup %1734 }
 0x7e1   :  { %v620_v32 = vadd.f32 1.0, %v1735_v25 }
 0x7e3   :  { %1736 = vrcp.f32 %v620_v32  ;;  %v647_v41 = vand.u32 2147483648, %v620_v32  ;;  %vm641_vm10 = vweird.f32 %v620_v32  ;;  %v645_v42 = vand.u32 2147483647, %v620_v32 }
 0x7e4   :  { %1738 = vpow2.f32 %v1579_v33 }
 0x7e5   :  { %v648_v46 = vor.u32 1.1754944e-38, %v647_v41  ;;  %vm646_vm12 = vcmp.eq.f32.partialorder %v645_v42, 8.507059e+37 }
 0x7e9   :  { %v1737_v34 = vpop.eup %1736 }
 0x7ea   :  { %v637_v35 = vmul.f32 %v1737_v34, %v620_v32  ;;  %v1739_v36 = vpop.eup %1738  ;;  %vm642_vm9 = vweird.f32 %v1737_v34 }
 0x7eb   :  { %v619_v38 = vadd.f32 1.0, %v1739_v36  ;;  %vm643_vm11 = vmor %vm641_vm10, %vm642_vm9 }
 0x7ec   :  { %v638_v37 = vsub.f32 1.0, %v637_v35 }
 0x7ed   :  { %1740 = vrcp.f32 %v619_v38  ;;  %v632_v58 = vand.u32 2147483648, %v619_v38  ;;  %vm626_vm14 = vweird.f32 %v619_v38  ;;  %v630_v59 = vand.u32 2147483647, %v619_v38 }
 0x7ee   :  { %v639_v39 = vmul.f32 %v1737_v34, %v638_v37 }
 0x7ef   :  { %v633_v0 = vor.u32 1.1754944e-38, %v632_v58  ;;  %vm631_vm0 = vcmp.eq.f32.partialorder %v630_v59, 8.507059e+37 }
 0x7f0   :  { %v640_v40 = vadd.f32 %v1737_v34, %v639_v39 }
 0x7f2   :  { %v644_v45 = vsel %vm643_vm11, %v1737_v34, %v640_v40 }
 0x7f3   :  { %v1741_v43 = vpop.eup %1740  ;;  %v649_v50 = vsel %vm646_vm12, %v648_v46, %v644_v45 }
 0x7f4   :  { %v622_v47 = vmul.f32 %v1741_v43, %v619_v38  ;;  %vm627_vm13 = vweird.f32 %v1741_v43  ;;  %v652_v44 = vmul.f32 %v649_v50, %v2252_v8 }
 0x7f5   :  { %vm628_vm15 = vmor %vm626_vm14, %vm627_vm13 }
 0x7f6   :  { %v623_v52 = vsub.f32 1.0, %v622_v47 }
 0x7f8   :  { %v624_v54 = vmul.f32 %v1741_v43, %v623_v52 }
 0x7fa   :  { %v625_v55 = vadd.f32 %v1741_v43, %v624_v54 }
 0x7fc   :  { %v629_v60 = vsel %vm628_vm15, %v1741_v43, %v625_v55 }
 0x7fd   :  { %v634_v2 = vsel %vm631_vm0, %v633_v0, %v629_v60 }
 0x7fe   :  { %v670_v6 = vmul.f32 %v634_v2, %v2257_v12 }
 0x839   :  { %v655_v48 = vpop.permute.xlu2 %654 }
 0x83a   :  { %v657_v51 = vmul.f32 %v655_v48, %v649_v50 }
 0x83c   :  { %659 = vrot.lane.b32.xlu1 %v657_v51, %s2046_s21 }
 0x84b   :  { %v673_v1 = vpop.permute.xlu0 %672 }
 0x84c   :  { %v675_v4 = vmul.f32 %v673_v1, %v634_v2 }
 0x84e   :  { %677 = vrot.lane.b32.xlu2 %v675_v4, %s2046_s21 }
 0x8a8   :  { %v678_v9 = vpop.permute.xlu2 %677 }
 0x8a9   :  { %v2283_v10 = vadd.f32 %v678_v9, %v670_v6 }
 0x8ab   :  { %1742 = vtanh.f32 %v2283_v10 }
 0x8ae   :  { %v660_v14 = vpop.permute.xlu1 %659 }
 0x8af   :  { %v2287_v15 = vadd.f32 %v660_v14, %v652_v44 }
 0x8b1   :  { %v1743_v61 = vpop.eup %1742  ;;  %1744 = vtanh.f32 %v2287_v15 }
 0x8b2   :  { %683 = vrot.lane.b32.xlu1 %v1743_v61, %s2033_s16 }
 0x8b7   :  { %v1745_v18 = vpop.eup %1744 }
 0x8b8   :  { %665 = vrot.lane.b32.xlu0 %v1745_v18, %s2033_s16 }
 0x924   :  { %v684_v19 = vpop.permute.xlu1 %683 }
 0x925   :  { %v686_v12 = vmul.f32 %v684_v19, %v634_v2 }
 0x927   :  { %688 = vrot.lane.b32.xlu2 %v686_v12, %s2046_s21 }
 0x92a   :  { %v666_v20 = vpop.permute.xlu0 %665 }
 0x92b   :  { %v668_v21 = vmul.f32 %v666_v20, %v649_v50 }
 0x92d   :  { %692 = vrot.lane.b32.xlu0 %v668_v21, %s2033_s16  ;;  %v811_v21 = vrot.slane %v2304_v28, 2 }
 0x981   :  { %v689_v8 = vpop.permute.xlu2 %688 }
 0x99f   :  { %v693_v3 = vpop.permute.xlu0 %692 }
 0x9a0   :  { %v695_v22 = vsel %vm302_vm6, %v689_v8, %v693_v3 }
 0x9a1   :  { %v696_v24 = vpack.c.bf16 %v695_v22, %v695_v22 }
 0x9a3   :  { %1581 = vmatmul.msk.bf16.vlgmr.msrb.gmra.mxu3 %vm231_vm1, %v696_v24  ;;  %1582 = vmatmul.msk.bf16.vlgmr.msra.gmra.mxu0 %vm231_vm1, %v696_v24 }
 0x9a4   :  { %1163 = vmatpush.bf16.msrb.mxu3 %v2148_v53 }
 0x9a8   :  { %1164 = vmatpush.bf16.msrb.mxu3 %v2155_v57 }
 0x9ac   :  { %1165 = vmatpush.bf16.msrb.mxu3 %v2163_v63 }
 0x9b0   :  { %1166 = vmatpush.bf16.msrb.mxu3 %v2173_v7 }
 0xa20   :  { %v722_v26 = vpop.f32.mrf.mxu0 }
 0xa21   :  { %v723_v27 = vadd.f32 %v2209_v11, %v722_v26 }
 0xa23   :  { %1746 = vtanh.f32 %v723_v27  ;;  %v1584_v31 = vmul.f32 -1.442695, %v723_v27 }
 0xa26   :  { %v709_v56 = vpop.f32.mrf.mxu3 }
 0xa27   :  { %v710_v29 = vadd.f32 %v709_v56, %v2304_v28 }
 0xa28   :  { %v724_v30 = vpop.f32.mrf.mxu0 }
 0xa29   :  { %v1747_v62 = vpop.eup %1746  ;;  %1748 = vtanh.f32 %v710_v29  ;;  %v1583_v63 = vmul.f32 -1.442695, %v710_v29 }
 0xa2a   :  { %767 = vrot.lane.b32.xlu1 %v1747_v62, %s2033_s16 }
 0xa2b   :  { %1750 = vpow2.f32 %v1583_v63 }
 0xa2e   :  { %v711_v53 = vpop.f32.mrf.mxu3 }
 0xa2f   :  { %v1749_v57 = vpop.eup %1748 }
 0xa30   :  { %785 = vrot.lane.b32.xlu2 %v1749_v57, %s2033_s16 }
 0xa31   :  { %v1751_v7 = vpop.eup %1750 }
 0xa32   :  { %v732_v5 = vadd.f32 1.0, %v1751_v7 }
 0xa34   :  { %1752 = vrcp.f32 %v732_v5  ;;  %v745_v36 = vand.u32 2147483648, %v732_v5  ;;  %vm739_vm3 = vweird.f32 %v732_v5  ;;  %v743_v37 = vand.u32 2147483647, %v732_v5 }
 0xa35   :  { %1754 = vpow2.f32 %v1584_v31 }
 0xa36   :  { %v746_v40 = vor.u32 1.1754944e-38, %v745_v36  ;;  %vm744_vm5 = vcmp.eq.f32.partialorder %v743_v37, 8.507059e+37 }
 0xa3a   :  { %v1753_v23 = vpop.eup %1752 }
 0xa3b   :  { %v735_v16 = vmul.f32 %v1753_v23, %v732_v5  ;;  %v1755_v25 = vpop.eup %1754  ;;  %vm740_vm2 = vweird.f32 %v1753_v23 }
 0xa3c   :  { %v733_v33 = vadd.f32 1.0, %v1755_v25  ;;  %vm741_vm4 = vmor %vm739_vm3, %vm740_vm2 }
 0xa3d   :  { %v736_v32 = vsub.f32 1.0, %v735_v16 }
 0xa3e   :  { %1756 = vrcp.f32 %v733_v33  ;;  %v760_v50 = vand.u32 2147483648, %v733_v33  ;;  %vm754_vm8 = vweird.f32 %v733_v33  ;;  %v758_v51 = vand.u32 2147483647, %v733_v33 }
 0xa3f   :  { %v737_v34 = vmul.f32 %v1753_v23, %v736_v32 }
 0xa40   :  { %v761_v54 = vor.u32 1.1754944e-38, %v760_v50  ;;  %vm759_vm10 = vcmp.eq.f32.partialorder %v758_v51, 8.507059e+37 }
 0xa41   :  { %v738_v35 = vadd.f32 %v1753_v23, %v737_v34 }
 0xa43   :  { %v742_v39 = vsel %vm741_vm4, %v1753_v23, %v738_v35 }
 0xa44   :  { %v1757_v38 = vpop.eup %1756  ;;  %v747_v43 = vsel %vm744_vm5, %v746_v40, %v742_v39 }
 0xa45   :  { %v750_v41 = vmul.f32 %v1757_v38, %v733_v33  ;;  %vm755_vm7 = vweird.f32 %v1757_v38  ;;  %v783_v60 = vmul.f32 %v747_v43, %v2283_v10 }
 0xa46   :  { %vm756_vm9 = vmor %vm754_vm8, %vm755_vm7 }
 0xa47   :  { %v751_v46 = vsub.f32 1.0, %v750_v41 }
 0xa49   :  { %v752_v47 = vmul.f32 %v1757_v38, %v751_v46 }
 0xa4b   :  { %v753_v48 = vadd.f32 %v1757_v38, %v752_v47 }
 0xa4d   :  { %v757_v52 = vsel %vm756_vm9, %v1757_v38, %v753_v48 }
 0xa4e   :  { %v762_v58 = vsel %vm759_vm10, %v761_v54, %v757_v52 }
 0xa4f   :  { %v765_v4 = vmul.f32 %v762_v58, %v2287_v15 }
 0xa8a   :  { %v786_v42 = vpop.permute.xlu2 %785 }
 0xa8b   :  { %v788_v45 = vmul.f32 %v786_v42, %v747_v43 }
 0xa8d   :  { %790 = vrot.lane.b32.xlu1 %v788_v45, %s2046_s21 }
 0xa9c   :  { %v768_v55 = vpop.permute.xlu1 %767 }
 0xa9d   :  { %v770_v59 = vmul.f32 %v768_v55, %v762_v58 }
 0xa9f   :  { %772 = vrot.lane.b32.xlu0 %v770_v59, %s2046_s21 }
 0xaff   :  { %v791_v0 = vpop.permute.xlu1 %790 }
 0xb00   :  { %v2312_v1 = vadd.f32 %v791_v0, %v783_v60 }
 0xb02   :  { %1758 = vtanh.f32 %v2312_v1 }
 0xb08   :  { %v1759_v2 = vpop.eup %1758 }
 0xb09   :  { %796 = vrot.lane.b32.xlu0 %v1759_v2, %s2033_s16 }
 0xb11   :  { %v773_v6 = vpop.permute.xlu0 %772 }
 0xb12   :  { %v2317_v9 = vadd.f32 %v773_v6, %v765_v4 }
 0xb14   :  { %1760 = vtanh.f32 %v2317_v9 }
 0xb1a   :  { %v1761_v44 = vpop.eup %1760 }
 0xb1b   :  { %778 = vrot.lane.b32.xlu2 %v1761_v44, %s2033_s16 }
 0xb75   :  { %v779_v14 = vpop.permute.xlu2 %778 }
 0xb76   :  { %v781_v10 = vmul.f32 %v779_v14, %v762_v58 }
 0xb78   :  { %805 = vrot.lane.b32.xlu2 %v781_v10, %s2033_s16 }
 0xb7b   :  { %v797_v61 = vpop.permute.xlu0 %796 }
 0xb7c   :  { %v799_v18 = vmul.f32 %v797_v61, %v747_v43 }
 0xb7e   :  { %801 = vrot.lane.b32.xlu1 %v799_v18, %s2046_s21 }
 0xbd2   :  { %v806_v19 = vpop.permute.xlu2 %805 }
 0xbf0   :  { %v802_v12 = vpop.permute.xlu1 %801 }
 0xbf1   :  { %v808_v15 = vsel %vm302_vm6, %v802_v12, %v806_v19  ;;  %v926_v12 = vrot.slane %v2304_v28, 4 }
 0xbf2   :  { %v809_v20 = vpack.c.bf16 %v808_v15, %v808_v15 }
 0xbf4   :  { %1585 = vmatmul.msk.bf16.vlgmr.msra.gmra.mxu1 %vm231_vm1, %v809_v20  ;;  %1586 = vmatmul.msk.bf16.vlgmr.msra.gmra.mxu2 %vm231_vm1, %v809_v20 }
 0xc71   :  { %v825_v8 = vpop.f32.mrf.mxu1 }
 0xc72   :  { %v826_v3 = vadd.f32 %v825_v8, %v811_v21 }
 0xc74   :  { %1762 = vtanh.f32 %v826_v3  ;;  %v1587_v30 = vmul.f32 -1.442695, %v826_v3 }
 0xc77   :  { %v838_v22 = vpop.f32.mrf.mxu2 }
 0xc78   :  { %v839_v24 = vadd.f32 %v838_v22, %v347_v13 }
 0xc79   :  { %v827_v26 = vpop.f32.mrf.mxu1 }
 0xc7a   :  { %v1763_v27 = vpop.eup %1762  ;;  %1764 = vtanh.f32 %v839_v24  ;;  %v1588_v62 = vmul.f32 -1.442695, %v839_v24 }
 0xc7b   :  { %901 = vrot.lane.b32.xlu1 %v1763_v27, %s2033_s16  ;;  %1766 = vpow2.f32 %v1587_v30 }
 0xc7c   :  { %1768 = vpow2.f32 %v1588_v62 }
 0xc7f   :  { %v840_v56 = vpop.f32.mrf.mxu2 }
 0xc80   :  { %v1765_v29 = vpop.eup %1764 }
 0xc81   :  { %883 = vrot.lane.b32.xlu0 %v1765_v29, %s2033_s16  ;;  %v1767_v53 = vpop.eup %1766 }
 0xc82   :  { %v848_v57 = vadd.f32 1.0, %v1767_v53  ;;  %v1769_v63 = vpop.eup %1768 }
 0xc83   :  { %v849_v7 = vadd.f32 1.0, %v1769_v63 }
 0xc84   :  { %1770 = vrcp.f32 %v848_v57  ;;  %v861_v34 = vand.u32 2147483648, %v848_v57  ;;  %vm855_vm12 = vweird.f32 %v848_v57  ;;  %v859_v35 = vand.u32 2147483647, %v848_v57 }
 0xc85   :  { %1772 = vrcp.f32 %v849_v7  ;;  %v876_v42 = vand.u32 2147483648, %v849_v7  ;;  %vm870_vm0 = vweird.f32 %v849_v7  ;;  %v874_v45 = vand.u32 2147483647, %v849_v7 }
 0xc86   :  { %v862_v38 = vor.u32 1.1754944e-38, %v861_v34  ;;  %vm860_vm14 = vcmp.eq.f32.partialorder %v859_v35, 8.507059e+37 }
 0xc87   :  { %v877_v47 = vor.u32 1.1754944e-38, %v876_v42  ;;  %vm875_vm3 = vcmp.eq.f32.partialorder %v874_v45, 8.507059e+37 }
 0xc8a   :  { %v1771_v5 = vpop.eup %1770 }
 0xc8b   :  { %v851_v13 = vmul.f32 %v1771_v5, %v848_v57  ;;  %v1773_v31 = vpop.eup %1772  ;;  %vm856_vm11 = vweird.f32 %v1771_v5 }
 0xc8c   :  { %v866_v16 = vmul.f32 %v1773_v31, %v849_v7  ;;  %vm857_vm13 = vmor %vm855_vm12, %vm856_vm11  ;;  %vm871_vm15 = vweird.f32 %v1773_v31 }
 0xc8d   :  { %v852_v23 = vsub.f32 1.0, %v851_v13  ;;  %vm872_vm2 = vmor %vm870_vm0, %vm871_vm15 }
 0xc8e   :  { %v867_v32 = vsub.f32 1.0, %v866_v16 }
 0xc8f   :  { %v853_v25 = vmul.f32 %v1771_v5, %v852_v23 }
 0xc90   :  { %v868_v36 = vmul.f32 %v1773_v31, %v867_v32 }
 0xc91   :  { %v854_v33 = vadd.f32 %v1771_v5, %v853_v25 }
 0xc92   :  { %v869_v39 = vadd.f32 %v1773_v31, %v868_v36 }
 0xc93   :  { %v858_v37 = vsel %vm857_vm13, %v1771_v5, %v854_v33 }
 0xc94   :  { %v863_v41 = vsel %vm860_vm14, %v862_v38, %v858_v37  ;;  %v873_v46 = vsel %vm872_vm2, %v1773_v31, %v869_v39 }
 0xc95   :  { %v878_v50 = vsel %vm875_vm3, %v877_v47, %v873_v46  ;;  %v899_v59 = vmul.f32 %v863_v41, %v2312_v1 }
 0xc96   :  { %v881_v52 = vmul.f32 %v878_v50, %v2317_v9 }
 0xced   :  { %v902_v40 = vpop.permute.xlu1 %901 }
 0xcee   :  { %v904_v43 = vmul.f32 %v902_v40, %v863_v41 }
 0xcf0   :  { %906 = vrot.lane.b32.xlu0 %v904_v43, %s2046_s21 }
 0xcf3   :  { %v884_v48 = vpop.permute.xlu0 %883 }
 0xcf4   :  { %v886_v51 = vmul.f32 %v884_v48, %v878_v50 }
 0xcf6   :  { %888 = vrot.lane.b32.xlu2 %v886_v51, %s2046_s21 }
 0xd50   :  { %v889_v54 = vpop.permute.xlu2 %888 }
 0xd51   :  { %v2334_v55 = vadd.f32 %v889_v54, %v881_v52 }
 0xd53   :  { %1774 = vtanh.f32 %v2334_v55 }
 0xd59   :  { %v1775_v58 = vpop.eup %1774 }
 0xd5a   :  { %894 = vrot.lane.b32.xlu1 %v1775_v58, %s2033_s16 }
 0xd62   :  { %v907_v60 = vpop.permute.xlu0 %906 }
 0xd63   :  { %v2339_v0 = vadd.f32 %v907_v60, %v899_v59 }
 0xd65   :  { %1776 = vtanh.f32 %v2339_v0 }
 0xd6b   :  { %v1777_v2 = vpop.eup %1776 }
 0xd6c   :  { %912 = vrot.lane.b32.xlu2 %v1777_v2, %s2033_s16 }
 0xdc6   :  { %v913_v4 = vpop.permute.xlu2 %912 }
 0xdc7   :  { %v915_v6 = vmul.f32 %v913_v4, %v863_v41 }
 0xdc9   :  { %917 = vrot.lane.b32.xlu0 %v915_v6, %s2046_s21 }
 0xdcc   :  { %v895_v9 = vpop.permute.xlu1 %894 }
 0xdcd   :  { %v897_v44 = vmul.f32 %v895_v9, %v878_v50  ;;  %v1041_v9 = vrot.slane %v2304_v28, 6 }
 0xdcf   :  { %921 = vrot.lane.b32.xlu1 %v897_v44, %s2033_s16 }
 0xe3b   :  { %v918_v14 = vpop.permute.xlu0 %917 }
 0xe41   :  { %v922_v10 = vpop.permute.xlu1 %921 }
 0xe42   :  { %v924_v1 = vsel %vm302_vm6, %v918_v14, %v922_v10 }
 0xe43   :  { %v925_v61 = vpack.c.bf16 %v924_v1, %v924_v1 }
 0xe45   :  { %1589 = vmatmul.msk.bf16.vlgmr.msra.gmra.mxu3 %vm231_vm1, %v925_v61  ;;  %1590 = vmatmul.msk.bf16.vlgmr.msrb.gmra.mxu0 %vm231_vm1, %v925_v61 }
 0xec2   :  { %v953_v18 = vpop.f32.mrf.mxu0 }
 0xec3   :  { %v954_v19 = vadd.f32 %v953_v18, %v464_v17 }
 0xec5   :  { %1778 = vtanh.f32 %v954_v19  ;;  %v1592_v24 = vmul.f32 -1.442695, %v954_v19 }
 0xec8   :  { %v940_v15 = vpop.f32.mrf.mxu3 }
 0xec9   :  { %v941_v20 = vadd.f32 %v940_v15, %v926_v12 }
 0xeca   :  { %v955_v21 = vpop.f32.mrf.mxu0 }
 0xecb   :  { %v1779_v8 = vpop.eup %1778  ;;  %1780 = vtanh.f32 %v941_v20  ;;  %v1591_v29 = vmul.f32 -1.442695, %v941_v20 }
 0xecc   :  { %998 = vrot.lane.b32.xlu2 %v1779_v8, %s2033_s16  ;;  %1782 = vpow2.f32 %v1592_v24 }
 0xed0   :  { %v942_v3 = vpop.f32.mrf.mxu3 }
 0xed1   :  { %v1781_v22 = vpop.eup %1780 }
 0xed2   :  { %1016 = vrot.lane.b32.xlu0 %v1781_v22, %s2033_s16  ;;  %v1783_v26 = vpop.eup %1782 }
 0xed3   :  { %v964_v27 = vadd.f32 1.0, %v1783_v26 }
 0xed5   :  { %1784 = vrcp.f32 %v964_v27  ;;  %v991_v57 = vand.u32 2147483648, %v964_v27  ;;  %vm985_vm5 = vweird.f32 %v964_v27  ;;  %v989_v7 = vand.u32 2147483647, %v964_v27 }
 0xed6   :  { %1786 = vpow2.f32 %v1591_v29 }
 0xed7   :  { %v992_v31 = vor.u32 1.1754944e-38, %v991_v57  ;;  %vm990_vm8 = vcmp.eq.f32.partialorder %v989_v7, 8.507059e+37 }
 0xedb   :  { %v1785_v17 = vpop.eup %1784 }
 0xedc   :  { %v981_v56 = vmul.f32 %v1785_v17, %v964_v27  ;;  %vm986_vm4 = vweird.f32 %v1785_v17  ;;  %v1787_v63 = vpop.eup %1786 }
 0xedd   :  { %vm987_vm7 = vmor %vm985_vm5, %vm986_vm4  ;;  %v963_v13 = vadd.f32 1.0, %v1787_v63 }
 0xede   :  { %v982_v30 = vsub.f32 1.0, %v981_v56 }
 0xedf   :  { %1788 = vrcp.f32 %v963_v13  ;;  %v976_v37 = vand.u32 2147483648, %v963_v13  ;;  %vm970_vm10 = vweird.f32 %v963_v13  ;;  %v974_v38 = vand.u32 2147483647, %v963_v13 }
 0xee0   :  { %v983_v62 = vmul.f32 %v1785_v17, %v982_v30 }
 0xee1   :  { %v977_v40 = vor.u32 1.1754944e-38, %v976_v37  ;;  %vm975_vm12 = vcmp.eq.f32.partialorder %v974_v38, 8.507059e+37 }
 0xee2   :  { %v984_v53 = vadd.f32 %v1785_v17, %v983_v62 }
 0xee4   :  { %v988_v5 = vsel %vm987_vm7, %v1785_v17, %v984_v53 }
 0xee5   :  { %v993_v16 = vsel %vm990_vm8, %v992_v31, %v988_v5  ;;  %v1789_v32 = vpop.eup %1788 }
 0xee6   :  { %v966_v33 = vmul.f32 %v1789_v32, %v963_v13  ;;  %vm971_vm9 = vweird.f32 %v1789_v32  ;;  %v996_v45 = vmul.f32 %v993_v16, %v2334_v55 }
 0xee7   :  { %vm972_vm11 = vmor %vm970_vm10, %vm971_vm9 }
 0xee8   :  { %v967_v34 = vsub.f32 1.0, %v966_v33 }
 0xeea   :  { %v968_v35 = vmul.f32 %v1789_v32, %v967_v34 }
 0xeec   :  { %v969_v36 = vadd.f32 %v1789_v32, %v968_v35 }
 0xeee   :  { %v973_v39 = vsel %vm972_vm11, %v1789_v32, %v969_v36 }
 0xeef   :  { %v978_v42 = vsel %vm975_vm12, %v977_v40, %v973_v39 }
 0xef0   :  { %v1014_v48 = vmul.f32 %v978_v42, %v2339_v0 }
 0xf26   :  { %v999_v23 = vpop.permute.xlu2 %998 }
 0xf27   :  { %v1001_v25 = vmul.f32 %v999_v23, %v993_v16 }
 0xf29   :  { %1003 = vrot.lane.b32.xlu1 %v1001_v25, %s2046_s21 }
 0xf44   :  { %v1017_v41 = vpop.permute.xlu0 %1016 }
 0xf45   :  { %v1019_v43 = vmul.f32 %v1017_v41, %v978_v42 }
 0xf47   :  { %1021 = vrot.lane.b32.xlu2 %v1019_v43, %s2046_s21 }
 0xf9b   :  { %v1004_v46 = vpop.permute.xlu1 %1003 }
 0xf9c   :  { %v2356_v47 = vadd.f32 %v1004_v46, %v996_v45 }
 0xf9e   :  { %1790 = vtanh.f32 %v2356_v47 }
 0xfa1   :  { %v1022_v50 = vpop.permute.xlu2 %1021 }
 0xfa2   :  { %v2360_v51 = vadd.f32 %v1022_v50, %v1014_v48 }
 0xfa4   :  { %v1791_v52 = vpop.eup %1790  ;;  %1792 = vtanh.f32 %v2360_v51 }
 0xfa5   :  { %1009 = vrot.lane.b32.xlu0 %v1791_v52, %s2033_s16 }
 0xfaa   :  { %v1793_v54 = vpop.eup %1792 }
 0xfab   :  { %1027 = vrot.lane.b32.xlu1 %v1793_v54, %s2033_s16 }
0x1017   :  { %v1010_v58 = vpop.permute.xlu0 %1009 }
0x1018   :  { %v1012_v55 = vmul.f32 %v1010_v58, %v993_v16  ;;  %v1838_v58 = vld [vmem:[%s2440_s5] ss:$0 sm:$0xff]  ;;  %s2047_s5 = smov [#allocation16]  }
0x101a   :  { %1036 = vrot.lane.b32.xlu0 %v1012_v55, %s2033_s16 }
0x101d   :  { %v1028_v59 = vpop.permute.xlu1 %1027 }
0x101e   :  { %v1030_v60 = vmul.f32 %v1028_v59, %v978_v42 }
0x1020   :  { %1032 = vrot.lane.b32.xlu2 %v1030_v60, %s2046_s21 }
0x107a   :  { %v1033_v0 = vpop.permute.xlu2 %1032 }
0x108c   :  { %v1037_v2 = vpop.permute.xlu0 %1036 }
0x108d   :  { %v1039_v4 = vsel %vm302_vm6, %v1033_v0, %v1037_v2 }
0x108e   :  { %v1040_v6 = vpack.c.bf16 %v1039_v4, %v1039_v4 }
0x1090   :  { %1593 = vmatmul.msk.bf16.vlgmr.msrb.gmra.mxu1 %vm231_vm1, %v1040_v6  ;;  %1594 = vmatmul.msk.bf16.vlgmr.msrb.gmra.mxu2 %vm231_vm1, %v1040_v6 }
0x110d   :  { %v1055_v44 = vpop.f32.mrf.mxu1 }
0x110e   :  { %v1056_v14 = vadd.f32 %v1055_v44, %v1041_v9 }
0x1110   :  { %1794 = vtanh.f32 %v1056_v14  ;;  %v1595_v15 = vmul.f32 -1.442695, %v1056_v14 }
0x1113   :  { %v1068_v10 = vpop.f32.mrf.mxu2 }
0x1114   :  { %v1069_v1 = vadd.f32 %v1068_v10, %v581_v49 }
0x1115   :  { %v1057_v61 = vpop.f32.mrf.mxu1 }
0x1116   :  { %v1795_v18 = vpop.eup %1794  ;;  %1796 = vtanh.f32 %v1069_v1  ;;  %v1596_v3 = vmul.f32 -1.442695, %v1069_v1 }
0x1117   :  { %1131 = vrot.lane.b32.xlu2 %v1795_v18, %s2033_s16  ;;  %1798 = vpow2.f32 %v1595_v15 }
0x111b   :  { %v1070_v19 = vpop.f32.mrf.mxu2 }
0x111c   :  { %v1797_v12 = vpop.eup %1796 }
0x111d   :  { %1113 = vrot.lane.b32.xlu1 %v1797_v12, %s2033_s16  ;;  %v1799_v20 = vpop.eup %1798 }
0x111e   :  { %v1078_v28 = vadd.f32 1.0, %v1799_v20 }
0x1120   :  { %1800 = vrcp.f32 %v1078_v28  ;;  %v1091_v24 = vand.u32 2147483648, %v1078_v28  ;;  %vm1085_vm14 = vweird.f32 %v1078_v28  ;;  %v1089_v27 = vand.u32 2147483647, %v1078_v28 }
0x1121   :  { %1802 = vpow2.f32 %v1596_v3 }
0x1122   :  { %v1092_v29 = vor.u32 1.1754944e-38, %v1091_v24  ;;  %vm1090_vm0 = vcmp.eq.f32.partialorder %v1089_v27, 8.507059e+37  ;;  %v1667_v27 = vld [vmem:[#allocation13 + $0x34] sm:$0xf] }
0x1126   :  { %v1801_v21 = vpop.eup %1800 }
0x1127   :  { %v1081_v8 = vmul.f32 %v1801_v21, %v1078_v28  ;;  %vm1086_vm13 = vweird.f32 %v1801_v21  ;;  %v1803_v26 = vpop.eup %1802 }
0x1128   :  { %vm1087_vm15 = vmor %vm1085_vm14, %vm1086_vm13  ;;  %v1079_v56 = vadd.f32 1.0, %v1803_v26  ;;  %v1669_v26 = vld [vmem:[#allocation13 + $0x40] sm:$0xf0]  ;;  %vm1459_vm14 = vcmask 1041408  }
0x1129   :  { %v1082_v22 = vsub.f32 1.0, %v1081_v8 }
0x112a   :  { %1804 = vrcp.f32 %v1079_v56  ;;  %v1106_v31 = vand.u32 2147483648, %v1079_v56  ;;  %vm1100_vm3 = vweird.f32 %v1079_v56  ;;  %v1104_v23 = vand.u32 2147483647, %v1079_v56 }
0x112b   :  { %v1083_v11 = vmul.f32 %v1801_v21, %v1082_v22  ;;  %v1621_v22 = vld [vmem:[#allocation13 + $0x28] sm:$0xf] }
0x112c   :  { %v1107_v25 = vor.u32 1.1754944e-38, %v1106_v31  ;;  %vm1105_vm5 = vcmp.eq.f32.partialorder %v1104_v23, 8.507059e+37  ;;  %v1609_v31 = vld [vmem:[#allocation13 + $0x8] sm:$0xf]  ;;  %v1664_v23 = vld [vmem:[#allocation13 + $0x18] sm:$0xf0] }
0x112d   :  { %v1084_v49 = vadd.f32 %v1801_v21, %v1083_v11  ;;  %v1668_v11 = vld [vmem:[#allocation13 + $0x38] sm:$0xf0] }
0x112e   :  { %v1622_v24 = vor.u32 %v1668_v11, %v1621_v22 }
0x112f   :  { %v1088_v17 = vsel %vm1087_vm15, %v1801_v21, %v1084_v49  ;;  %v1629_v49 = vld [vmem:[#allocation13 + $0x30] sm:$0xf] }
0x1130   :  { %v1093_v62 = vsel %vm1090_vm0, %v1092_v29, %v1088_v17  ;;  %v1805_v57 = vpop.eup %1804  ;;  %v1631_v17 = vld [vmem:[#allocation13 + $0x44] sm:$0xf0]  ;;  %1298 = vmatpush.bf16.msra.mxu0 %v1622_v24 }
0x1131   :  { %v1096_v63 = vmul.f32 %v1805_v57, %v1079_v56  ;;  %vm1101_vm2 = vweird.f32 %v1805_v57  ;;  %v1129_v35 = vmul.f32 %v1093_v62, %v2360_v51  ;;  %v1630_v56 = vor.u32 %v1669_v26, %v1629_v49 }
0x1132   :  { %vm1102_vm4 = vmor %vm1100_vm3, %vm1101_vm2  ;;  %v1634_v29 = vor.u32 %v1667_v27, %v1631_v17 }
0x1133   :  { %v1097_v7 = vsub.f32 1.0, %v1096_v63  ;;  %v1623_v63 = vld [vmem:[#allocation13 + $0x3c] sm:$0xf0]  ;;  %1324 = vmatpush.bf16.msra.mxu2 %v1630_v56 }
0x1134   :  { %1337 = vmatpush.bf16.msra.mxu3 %v1634_v29 }
0x1135   :  { %v1098_v5 = vmul.f32 %v1805_v57, %v1097_v7  ;;  %v1661_v7 = vld [vmem:[#allocation13 + $0x4] sm:$0xf] }
0x1137   :  { %v1099_v13 = vadd.f32 %v1805_v57, %v1098_v5  ;;  %v1603_v5 = vld [vmem:[#allocation13 + $0x14] sm:$0xf0] }
0x1139   :  { %v1103_v16 = vsel %vm1102_vm4, %v1805_v57, %v1099_v13 }
0x113a   :  { %v1108_v33 = vsel %vm1105_vm5, %v1107_v25, %v1103_v16  ;;  %v1662_v16 = vld [vmem:[#allocation13 + $0xc] sm:$0xf]  ;;  %v1610_v25 = vor.u32 %v1664_v23, %v1609_v31 }
0x113b   :  { %v1111_v39 = vmul.f32 %v1108_v33, %v2356_v47 }
0x113c   :  { %1325 = vmatpush.bf16.msra.mxu2 %v1610_v25 }
0x1171   :  { %v1132_v30 = vpop.permute.xlu2 %1131 }
0x1172   :  { %v1134_v53 = vmul.f32 %v1132_v30, %v1093_v62  ;;  %v1601_v30 = vld [vmem:[#allocation13] sm:$0xf] }
0x1174   :  { %1136 = vrot.lane.b32.xlu1 %v1134_v53, %s2046_s21  ;;  %v1666_v53 = vld [vmem:[#allocation13 + $0x2c] sm:$0xf] }
0x1175   :  { %v1626_v13 = vor.u32 %v1666_v53, %v1623_v63 }
0x1177   :  { %1311 = vmatpush.bf16.msra.mxu1 %v1626_v13 }
0x118f   :  { %v1114_v32 = vpop.permute.xlu1 %1113 }
0x1190   :  { %v1116_v34 = vmul.f32 %v1114_v32, %v1108_v33  ;;  %v1611_v32 = vld [vmem:[#allocation13 + $0x1c] sm:$0xf0] }
0x1192   :  { %1118 = vrot.lane.b32.xlu0 %v1116_v34, %s2046_s21  ;;  %v1614_v34 = vor.u32 %v1662_v16, %v1611_v32 }
0x1194   :  { %1338 = vmatpush.bf16.msra.mxu3 %v1614_v34 }
0x11e6   :  { %v1137_v36 = vpop.permute.xlu1 %1136 }
0x11e7   :  { %v1139_v37 = vadd.f32 %v1137_v36, %v1129_v35 }
0x11e9   :  { %1806 = vtanh.f32 %v1139_v37 }
0x11ef   :  { %v1807_v38 = vpop.eup %1806 }
0x11f0   :  { %1142 = vrot.lane.b32.xlu0 %v1807_v38, %s2033_s16  ;;  %v1637_v38 = vld [vmem:[#allocation13 + $0x38] sm:$0xf] }
0x1204   :  { %v1119_v40 = vpop.permute.xlu0 %1118 }
0x1205   :  { %v1121_v41 = vadd.f32 %v1119_v40, %v1111_v39  ;;  %v1670_v39 = vld [vmem:[#allocation13 + $0x48] sm:$0xf0]  ;;  %v1617_v40 = vld [vmem:[#allocation13 + $0x10] sm:$0xf] }
0x1207   :  { %1808 = vtanh.f32 %v1121_v41 }
0x120d   :  { %v1809_v42 = vpop.eup %1808 }
0x120e   :  { %1124 = vrot.lane.b32.xlu2 %v1809_v42, %s2033_s16  ;;  %v1665_v42 = vld [vmem:[#allocation13 + $0x20] sm:$0xf0] }
0x1262   :  { %v1143_v43 = vpop.permute.xlu0 %1142 }
0x1263   :  { %v1145_v45 = vmul.f32 %v1143_v43, %v1093_v62  ;;  %v1663_v62 = vld [vmem:[#allocation13 + $0x10] sm:$0xf0]  ;;  %v1618_v43 = vor.u32 %v1665_v42, %v1617_v40 }
0x1264   :  { %v1602_v57 = vor.u32 %v1663_v62, %v1601_v30 }
0x1265   :  { %1147 = vrot.lane.b32.xlu1 %v1145_v45, %s2046_s21 }
0x1266   :  { %1299 = vmatpush.bf16.msra.mxu0 %v1602_v57 }
0x1268   :  { %v1125_v46 = vpop.permute.xlu2 %1124 }
0x1269   :  { %v1127_v48 = vmul.f32 %v1125_v46, %v1108_v33  ;;  %v1606_v33 = vor.u32 %v1661_v7, %v1603_v5  ;;  %v1222_v46 = vld [vmem:[#allocation14] sm:$0x1f] }
0x126b   :  { %1151 = vrot.lane.b32.xlu2 %v1127_v48, %s2033_s16  ;;  %1312 = vmatpush.bf16.msra.mxu1 %v1606_v33  ;;  %v1224_v48 = vperm.slane %v1222_v46, 0 }
0x12c5   :  { %v1152_v50 = vpop.permute.xlu2 %1151 }
0x12d7   :  { %v1148_v51 = vpop.permute.xlu1 %1147 }
0x12d8   :  { %v1154_v52 = vsel %vm302_vm6, %v1148_v51, %v1152_v50  ;;  %v1225_v50 = vperm.slane %v1222_v46, 1 }
0x12d9   :  { %v1155_v54 = vpack.c.bf16 %v1154_v52, %v1154_v52 }
0x12db   :  { %1597 = vmatmul.msk.bf16.vlgmr.msrb.gmra.mxu3 %vm231_vm1, %v1155_v54 }
0x135e   :  { %v1168_v47 = vpop.f32.mrf.mxu3 }
0x135f   :  { %v1169_v55 = vadd.f32 %v1838_v58, %v1168_v47 }
0x1361   :  { %1810 = vtanh.f32 %v1169_v55  ;;  %v1598_v0 = vmul.f32 -1.442695, %v1169_v55 }
0x1363   :  { %1812 = vpow2.f32 %v1598_v0 }
0x1366   :  { %v1170_v59 = vpop.f32.mrf.mxu3 }
0x1367   :  { %v1811_v60 = vpop.eup %1810  ;;  %v1226_v59 = vperm.slane %v1222_v46, 2 }
0x1368   :  { %1194 = vrot.lane.b32.xlu0 %v1811_v60, %s2033_s16  ;;  %v1227_v60 = vperm.slane %v1222_v46, 3 }
0x1369   :  { %v1813_v2 = vpop.eup %1812 }
0x136a   :  { %v1175_v4 = vadd.f32 1.0, %v1813_v2 }
0x136c   :  { %1814 = vrcp.f32 %v1175_v4  ;;  %v1187_v1 = vand.u32 2147483648, %v1175_v4  ;;  %vm1181_vm7 = vweird.f32 %v1175_v4  ;;  %v1185_v61 = vand.u32 2147483647, %v1175_v4 }
0x136e   :  { %v1188_v19 = vor.u32 1.1754944e-38, %v1187_v1  ;;  %vm1186_vm9 = vcmp.eq.f32.partialorder %v1185_v61, 8.507059e+37 }
0x1372   :  { %v1815_v6 = vpop.eup %1814 }
0x1373   :  { %v1177_v9 = vmul.f32 %v1815_v6, %v1175_v4  ;;  %vm1182_vm1 = vweird.f32 %v1815_v6 }
0x1374   :  { %vm1183_vm8 = vmor %vm1181_vm7, %vm1182_vm1 }
0x1375   :  { %v1178_v44 = vsub.f32 1.0, %v1177_v9 }
0x1377   :  { %v1179_v14 = vmul.f32 %v1815_v6, %v1178_v44 }
0x1379   :  { %v1180_v10 = vadd.f32 %v1815_v6, %v1179_v14 }
0x137b   :  { %v1184_v18 = vsel %vm1183_vm8, %v1815_v6, %v1180_v10 }
0x137c   :  { %v1189_v15 = vsel %vm1186_vm9, %v1188_v19, %v1184_v18 }
0x137d   :  { %v1192_v28 = vmul.f32 %v1189_v15, %v1121_v41  ;;  %v1638_v41 = vor.u32 %v1670_v39, %v1637_v38 }
0x137f   :  { %1350 = vmatpush.bf16.msrb.mxu0 %v1638_v41 }
0x1383   :  { %1351 = vmatpush.bf16.msrb.mxu0 %v1618_v43 }
0x13da   :  { %v1195_v12 = vpop.permute.xlu0 %1194 }
0x13db   :  { %v1197_v20 = vmul.f32 %v1195_v12, %v1189_v15  ;;  %v1228_v12 = vperm.slane %v1222_v46, 4 }
0x13dd   :  { %1199 = vrot.lane.b32.xlu1 %v1197_v20, %s2046_s21 }
0x144f   :  { %v1200_v21 = vpop.permute.xlu1 %1199 }
0x1450   :  { %v1202_v8 = vadd.f32 %v1200_v21, %v1192_v28 }
0x1452   :  { %1816 = vtanh.f32 %v1202_v8 }
0x1458   :  { %v1817_v3 = vpop.eup %1816 }
0x1459   :  { %1205 = vrot.lane.b32.xlu2 %v1817_v3, %s2033_s16  ;;  %s1473_s16 = sshll.u32 %s2047_s5, 4  ;;  %s1474_s16 = int_to_ptr.vmem [resolvable:$true] %s1473_s16 }
0x14b3   :  { %v1206_v35 = vpop.permute.xlu2 %1205 }
0x14b4   :  { %v1208_v36 = vmul.f32 %v1206_v35, %v1189_v15 }
0x14b6   :  { %v1209_v37 = vpack.c.bf16 %v1208_v36, %v1208_v36 }
0x14b8   :  { %1235 = vrot.lane.b32.xlu0 %v1209_v37, %s2046_s21 }
0x152a   :  { %v1236_v45 = vpop.permute.xlu0 %1235 }
0x152b   :  { %1639 = vmatmul.msk.bf16.vlgmr.msra.gmra.mxu0 %vm302_vm6, %v1236_v45  ;;  %1640 = vmatmul.msk.bf16.vlgmr.msra.gmra.mxu1 %vm302_vm6, %v1236_v45 }
0x152c   :  { %1641 = vmatmul.msk.bf16.vlgmr.msra.gmra.mxu2 %vm302_vm6, %v1236_v45  ;;  %1642 = vmatmul.msk.bf16.vlgmr.msra.gmra.mxu3 %vm302_vm6, %v1236_v45 }
0x153b   :  { %1643 = vmatmul.msk.bf16.vlgmr.msrb.gmra.mxu0 %vm302_vm6, %v1236_v45 }
0x15a8   :  { %v1301_v51 = vpop.f32.mrf.mxu0  ;;  %v1314_v52 = vpop.f32.mrf.mxu1 }
0x15a9   :  { %v1302_v54 = vadd.f32 %v1301_v51, %v1224_v48  ;;  %v1315_v47 = vadd.f32 %v1314_v52, %v1225_v50 }
0x15ab   :  { %v1644_v58 = vmul.f32 -1.442695, %v1302_v54  ;;  %v1645_v55 = vmul.f32 -1.442695, %v1315_v47 }
0x15ad   :  { %1818 = vpow2.f32 %v1644_v58 }
0x15ae   :  { %1820 = vpow2.f32 %v1645_v55 }
0x15af   :  { %v1327_v0 = vpop.f32.mrf.mxu2  ;;  %v1340_v2 = vpop.f32.mrf.mxu3 }
0x15b0   :  { %v1328_v4 = vadd.f32 %v1327_v0, %v1226_v59  ;;  %v1341_v6 = vadd.f32 %v1340_v2, %v1227_v60  ;;  %v1303_v9 = vpop.f32.mrf.mxu0  ;;  %v1316_v44 = vpop.f32.mrf.mxu1 }
0x15b2   :  { %v1646_v14 = vmul.f32 -1.442695, %v1328_v4  ;;  %v1647_v10 = vmul.f32 -1.442695, %v1341_v6 }
0x15b3   :  { %v1819_v1 = vpop.eup %1818 }
0x15b4   :  { %v1821_v61 = vpop.eup %1820  ;;  %v2397_v18 = vadd.f32 1.0, %v1819_v1  ;;  %1822 = vpow2.f32 %v1646_v14 }
0x15b5   :  { %v1373_v19 = vadd.f32 1.0, %v1821_v61  ;;  %1824 = vpow2.f32 %v1647_v10 }
0x15b6   :  { %1826 = vrcp.f32 %v2397_v18  ;;  %vm1382_vm10 = vweird.f32 %v2397_v18  ;;  %v1388_v46 = vand.u32 2147483648, %v2397_v18  ;;  %v1386_v47 = vand.u32 2147483647, %v2397_v18 }
0x15b7   :  { %1828 = vrcp.f32 %v1373_v19  ;;  %v1329_v15 = vpop.f32.mrf.mxu2  ;;  %v1342_v20 = vpop.f32.mrf.mxu3  ;;  %v1403_v62 = vand.u32 2147483648, %v1373_v19  ;;  %v1401_v57 = vand.u32 2147483647, %v1373_v19  ;;  %vm1397_vm11 = vweird.f32 %v1373_v19 }
0x15b8   :  { %v1353_v28 = vpop.f32.mrf.mxu0  ;;  %v1389_v4 = vor.u32 1.1754944e-38, %v1388_v46 }
0x15b9   :  { %v1354_v21 = vadd.f32 %v1353_v28, %v1228_v12  ;;  %v1404_v23 = vor.u32 1.1754944e-38, %v1403_v62  ;;  %vm2410_vm13 = vcmp.eq.f32.partialorder %v1401_v57, 8.507059e+37 }
0x15ba   :  { %v1823_v8 = vpop.eup %1822 }
0x15bb   :  { %v1825_v3 = vpop.eup %1824  ;;  %v1374_v22 = vadd.f32 1.0, %v1823_v8  ;;  %v1648_v24 = vmul.f32 -1.442695, %v1354_v21 }
0x15bc   :  { %v2400_v11 = vpop.eup %1826  ;;  %v1375_v49 = vadd.f32 1.0, %v1825_v3 }
0x15bd   :  { %v1829_v26 = vpop.eup %1828  ;;  %v1378_v27 = vmul.f32 %v2400_v11, %v2397_v18  ;;  %1830 = vrcp.f32 %v1374_v22  ;;  %v1416_v34 = vand.u32 2147483647, %v1374_v22  ;;  %v1418_v35 = vand.u32 2147483648, %v1374_v22 }
0x15be   :  { %v1393_v17 = vmul.f32 %v1829_v26, %v1373_v19  ;;  %1832 = vrcp.f32 %v1375_v49  ;;  %vm1398_vm6 = vweird.f32 %v1829_v26  ;;  %vm1383_vm15 = vweird.f32 %v2400_v11 }
0x15bf   :  { %1834 = vpow2.f32 %v1648_v24  ;;  %v1379_v30 = vsub.f32 1.0, %v1378_v27  ;;  %vm2406_vm12 = vmor %vm1397_vm11, %vm1398_vm6  ;;  %v1431_v41 = vand.u32 2147483647, %v1375_v49  ;;  %v1433_v42 = vand.u32 2147483648, %v1375_v49 }
0x15c0   :  { %v1394_v56 = vsub.f32 1.0, %v1393_v17  ;;  %v1355_v29 = vpop.f32.mrf.mxu0  ;;  %vm1412_vm3 = vweird.f32 %v1374_v22  ;;  %vm2421_vm4 = vmor %vm1382_vm10, %vm1383_vm15  ;;  %v1419_v52 = vor.u32 1.1754944e-38, %v1418_v35  ;;  %vm1427_vm1 = vweird.f32 %v1375_v49 }
0x15c1   :  { %v1380_v31 = vmul.f32 %v2400_v11, %v1379_v30  ;;  %v1434_v58 = vor.u32 1.1754944e-38, %v1433_v42  ;;  %vm1417_vm8 = vcmp.eq.f32.partialorder %v1416_v34, 8.507059e+37  ;;  %vm1432_vm9 = vcmp.eq.f32.partialorder %v1431_v41, 8.507059e+37 }
0x15c2   :  { %v1395_v53 = vmul.f32 %v1829_v26, %v1394_v56  ;;  %vm1461_vm6 = vcmask 1045508   ;;  %vm1387_vm10 = vcmp.eq.f32.partialorder %v1386_v47, 8.507059e+37  ;;  %vm1463_vm11 = vcmask 1043456  }
0x15c3   :  { %v1831_v63 = vpop.eup %1830  ;;  %v1381_v45 = vadd.f32 %v2400_v11, %v1380_v31 }
0x15c4   :  { %v1833_v7 = vpop.eup %1832  ;;  %v1396_v5 = vadd.f32 %v1829_v26, %v1395_v53  ;;  %v1408_v13 = vmul.f32 %v1831_v63, %v1374_v22  ;;  %vm1413_vm0 = vweird.f32 %v1831_v63 }
0x15c5   :  { %v1423_v16 = vmul.f32 %v1833_v7, %v1375_v49  ;;  %v1835_v25 = vpop.eup %1834  ;;  %vm1428_vm2 = vweird.f32 %v1833_v7  ;;  %vm1414_vm5 = vmor %vm1412_vm3, %vm1413_vm0  ;;  %v1385_v59 = vsel %vm2421_vm4, %v2400_v11, %v1381_v45 }
0x15c6   :  { %v1409_v33 = vsub.f32 1.0, %v1408_v13  ;;  %v1376_v38 = vadd.f32 1.0, %v1835_v25  ;;  %v1400_v39 = vsel %vm2406_vm12, %v1829_v26, %v1396_v5  ;;  %vm1429_vm7 = vmor %vm1427_vm1, %vm1428_vm2  ;;  %v1390_v1 = vsel %vm1387_vm10, %v1389_v4, %v1385_v59 }
0x15c7   :  { %v1424_v37 = vsub.f32 1.0, %v1423_v16  ;;  %v1405_v51 = vsel %vm2410_vm13, %v1404_v23, %v1400_v39 }
0x15c8   :  { %v1410_v40 = vmul.f32 %v1831_v63, %v1409_v33  ;;  %1836 = vrcp.f32 %v1376_v38  ;;  %v1456_v2 = vrot.slane %v1405_v51, 6  ;;  %v1448_v15 = vand.u32 2147483648, %v1376_v38 }
0x15c9   :  { %v1425_v43 = vmul.f32 %v1833_v7, %v1424_v37  ;;  %v1446_v28 = vand.u32 2147483647, %v1376_v38  ;;  %vm1442_vm13 = vweird.f32 %v1376_v38 }
0x15ca   :  { %v1411_v48 = vadd.f32 %v1831_v63, %v1410_v40  ;;  %v1460_v61 = vsel %vm1459_vm14, %v1390_v1, %v1456_v2  ;;  %v1449_v8 = vor.u32 1.1754944e-38, %v1448_v15 }
0x15cb   :  { %v1426_v54 = vadd.f32 %v1833_v7, %v1425_v43  ;;  %vm1447_vm14 = vcmp.eq.f32.partialorder %v1446_v28, 8.507059e+37 }
0x15cc   :  { %v1415_v55 = vsel %vm1414_vm5, %v1831_v63, %v1411_v48 }
0x15cd   :  { %v1420_v60 = vsel %vm1417_vm8, %v1419_v52, %v1415_v55  ;;  %v1430_v0 = vsel %vm1429_vm7, %v1833_v7, %v1426_v54 }
0x15ce   :  { %v1435_v6 = vsel %vm1432_vm9, %v1434_v58, %v1430_v0  ;;  %v1457_v9 = vrot.slane %v1420_v60, 4  ;;  %v1837_v44 = vpop.eup %1836 }
0x15cf   :  { %v1458_v14 = vrot.slane %v1435_v6, 2  ;;  %v1438_v10 = vmul.f32 %v1837_v44, %v1376_v38  ;;  %vm1443_vm12 = vweird.f32 %v1837_v44 }
0x15d0   :  { %vm1444_vm15 = vmor %vm1442_vm13, %vm1443_vm12 }
0x15d1   :  { %v1462_v18 = vsel %vm1461_vm6, %v1457_v9, %v1458_v14  ;;  %v1439_v19 = vsub.f32 1.0, %v1438_v10 }
0x15d2   :  { %v1464_v12 = vsel %vm1463_vm11, %v1460_v61, %v1462_v18 }
0x15d3   :  { %1466 = vst [vmem:[#allocation16] sm:$0xff] %v1464_v12  ;;  %v1440_v20 = vmul.f32 %v1837_v44, %v1439_v19 }
0x15d5   :  { %v1441_v21 = vadd.f32 %v1837_v44, %v1440_v20 }
0x15d7   :  { %v1445_v3 = vsel %vm1444_vm15, %v1837_v44, %v1441_v21 }
0x15d8   :  { %v1450_v22 = vsel %vm1447_vm14, %v1449_v8, %v1445_v3 }
0x15d9   :  { %1467 = vst [vmem:[#allocation16 + $0x8] sm:$0x3] %v1450_v22 }
0x15da   :  { %1478 = dma.vmem_to_hbm [thread:$0]  %s1474_s16, 160, %s1476_s27, [#allocation7]  }
0x15db   :  { %2029 = dma.done.wait [#allocation7], 160  }
0x15dc   :  { %2030 = vsyncadd [#allocation7], 4294967136 }
0x15dd   :  { %1483 = vsyncpa [#allocation6], 1 }
0x15de   :  { %1484 = vsyncpa [#allocation9], 1 }
0x15df   :  { %1485 = vsyncpa [#allocation12], 1 }
0x15e0   :  { %1486 = vsyncpa [#allocation15], 1 }
0x15e1   :  { %1487 = vsyncpa [#allocation7], 1 }

</bundles_post_ra>
